<compile_context>
chip_gen: v6e
topology: v6e:2x2x1
jax: 0.10.0
libtpu: 0.0.40
codegen_flags: <defaults>
</compile_context>

<pallas_src>
import functools
import math

import jax
import jax.numpy as jnp
from jax import lax
from jax.experimental import pallas as pl
from jax.experimental.pallas import tpu as pltpu


def _round_up(a, b):
    return (a + b - 1) // b * b


def _conv3d_kernel(x_hbm, w_ref, o_ref, ring_ref, slab_ref, sem_ref, *,
                   kT, kH, kW, st, W_pad, Cin_pad, M, T_out, R, n_new):
    """One (batch, output-time) grid step.

    x_hbm   : (N, T_pad, Cin_pad, HW_ext) bf16 in HBM (memory_space=ANY)
    w_ref   : (Cout_pad, kT*kH*kW*Cin_pad) bf16, resident in VMEM (constant block)
    o_ref   : (1, 1, Cout_pad, M) output block, written once per step
    ring_ref: (R, Cin_pad, HW_ext) bf16 rolling window of input time slices
    slab_ref: (kT*kH*kW*Cin_pad, M) bf16 im2col slab
    sem_ref : (R,) DMA semaphores, one per ring slot
    """
    n = pl.program_id(0)
    t = pl.program_id(1)
    base = t * st

    def _copy(s):
        slot = s % R
        return pltpu.make_async_copy(x_hbm.at[n, s], ring_ref.at[slot],
                                     sem_ref.at[slot])

    # Batch start: fetch the entire first time window.
    @pl.when(t == 0)
    def _():
        for k in range(kT):
            _copy(base + k).start()

    # Prefetch the slices that become new at t+1 (overlaps this step's
    # wait + slab build + matmul).
    @pl.when(t + 1 < T_out)
    def _():
        nxt = (t + 1) * st
        for j in range(n_new):
            _copy(nxt + (kT - n_new) + j).start()

    # Wait only for this step's pending slices: all kT at t==0, otherwise the
    # n_new slices prefetched by step t-1.  Older slices are already resident.
    @pl.when(t == 0)
    def _():
        for k in range(kT):
            _copy(base + k).wait()

    @pl.when(t > 0)
    def _():
        for j in range(n_new):
            _copy(base + (kT - n_new) + j).wait()

    # im2col: every (kt, kh, kw) tap is a lane-shifted view of a resident time
    # slice, copied into sublane-aligned rows of the bf16 slab (no reshapes).
    for k in range(kT):
        src = ring_ref.at[(base + k) % R]
        for kh in range(kH):
            for kw in range(kW):
                off = kh * W_pad + kw
                row = ((k * kH + kh) * kW + kw) * Cin_pad
                slab_ref[row:row + Cin_pad, :] = src[:, off:off + M]

    # Single MXU matmul per output (n, t): (Cout, K) @ (K, M), K = kT*kH*kW*Cin_pad,
    # bf16 inputs with f32 accumulation.
    o_ref[0, 0] = jnp.dot(w_ref[...], slab_ref[...],
                          preferred_element_type=jnp.float32).astype(o_ref.dtype)


def spatio_temporal_conv(x_ncdhw, weight_oidhw, stride=(1, 1, 1), padding=(0, 0, 0)):
    """Forward of SpatioTemporalConv: y = Conv3d(x), bias=False.

    x_ncdhw      : (N, Cin, T, H, W)        -- PyTorch layout
    weight_oidhw : (Cout, Cin, kT, kH, kW)  -- PyTorch Conv3d weight layout
    returns      : (N, Cout, T_out, H_out, W_out)
    """
    N, Cin, T, H, W = x_ncdhw.shape
    Cout, Cin_w, kT, kH, kW = weight_oidhw.shape
    assert Cin == Cin_w
    st, sh, sw = stride
    pt, ph, pw = padding

    T_pad, H_pad, W_pad = T + 2 * pt, H + 2 * ph, W + 2 * pw
    T_out = (T_pad - kT) // st + 1
    H_out = (H_pad - kH) // sh + 1
    W_out = (W_pad - kW) // sw + 1
    H_full = H_pad - kH + 1          # stride-1 spatial extents (computed in-kernel)
    W_full = W_pad - kW + 1
    del W_full  # (implicit via the [:W_out] slice below)

    Cin_pad = _round_up(Cin, 16)                      # bf16 (16,128) tile alignment
    Cout_pad = _round_up(Cout, 8)
    M = _round_up(H_full * W_pad, 128)                # lane-dense output width
    max_off = (kH - 1) * W_pad + (kW - 1)
    HW_ext = _round_up(max_off + M, 128)              # input width incl. tap shifts
    assert HW_ext >= max_off + M, "lane shifts must stay inside the input block"
    assert HW_ext >= H_pad * W_pad
    K_total = kT * kH * kW * Cin_pad

    R = st + kT                                       # rolling-window ring slots
    n_new = min(st, kT)                               # new slices per step (t > 0)

    # Input glue: NCDHW -> (N, T_pad, Cin_pad, HW_ext) bf16; channels padded,
    # H*W flattened onto the lane axis, zero padding folded in.
    # TODO(synk): for multi-layer networks keep activations in this layout
    # between layers (masking padding inside the kernel) to avoid this per-call
    # relayout round trip through HBM.
    x = jnp.transpose(x_ncdhw, (0, 2, 1, 3, 4))                        # (N,T,Cin,H,W)
    x = jnp.pad(x, ((0, 0), (pt, pt), (0, Cin_pad - Cin), (ph, ph), (pw, pw)))
    x = x.reshape(N, T_pad, Cin_pad, H_pad * W_pad)
    x = jnp.pad(x, ((0, 0), (0, 0), (0, 0), (0, HW_ext - H_pad * W_pad)))
    x = x.astype(jnp.bfloat16)

    # Weight glue: OIDHW -> (Cout_pad, kT*kH*kW*Cin_pad) bf16, im2col-folded so
    # K-row order matches the slab build: (kt, kh, kw, cin).
    w = jnp.transpose(weight_oidhw, (0, 2, 3, 4, 1))                   # (Cout,kT,kH,kW,Cin)
    w = jnp.pad(w, ((0, Cout_pad - Cout), (0, 0), (0, 0), (0, 0),
                    (0, Cin_pad - Cin)))
    w = w.reshape(Cout_pad, K_total).astype(jnp.bfloat16)

    kernel = functools.partial(
        _conv3d_kernel, kT=kT, kH=kH, kW=kW, st=st, W_pad=W_pad,
        Cin_pad=Cin_pad, M=M, T_out=T_out, R=R, n_new=n_new)

    out = pl.pallas_call(
        kernel,
        out_shape=jax.ShapeDtypeStruct((N, T_out, Cout_pad, M), x_ncdhw.dtype),
        grid_spec=pltpu.PrefetchScalarGridSpec(
            num_scalar_prefetch=0,
            grid=(N, T_out),
            in_specs=[
                # Raw HBM ref: the kernel streams time slices with a manual
                # rolling-window DMA (each slice read once per batch).
                pl.BlockSpec(memory_space=pl.ANY),
                # Resident weights: constant block index -> DMA'd once.
                pl.BlockSpec((Cout_pad, K_total), lambda n, t: (0, 0)),
            ],
            out_specs=pl.BlockSpec((1, 1, Cout_pad, M),
                                   lambda n, t: (n, t, 0, 0)),
            scratch_shapes=[
                pltpu.VMEM((R, Cin_pad, HW_ext), jnp.bfloat16),   # input ring
                pltpu.VMEM((K_total, M), jnp.bfloat16),           # im2col slab
                pltpu.SemaphoreType.DMA((R,)),
            ],
        ),
        compiler_params=pltpu.CompilerParams(
            dimension_semantics=("parallel", "arbitrary")),
    )(x, w)

    # Output glue: drop channel/lane padding and shift-wrap columns, apply the
    # spatial stride, return to NCDHW.
    # TODO(synk): fold sh/sw into the slab build (strided lane slices) so a
    # strided spatial conv doesn't compute the stride-1 result and subsample.
    # TODO(synk): for real video shapes add an H-tiled grid axis with a kH-row
    # halo (sized for v7x's 64 MiB physical / 32 MiB scoped VMEM) plus a Cout
    # tile axis that reuses the resident im2col slab across Cout tiles.
    y = out[:, :, :Cout, :H_full * W_pad].reshape(N, T_out, Cout, H_full, W_pad)
    y = y[:, :, :, ::sh, ::sw][:, :, :, :H_out, :W_out]
    return jnp.transpose(y, (0, 2, 1, 3, 4))


if __name__ == "__main__":
    # Small shapes consistent with the module: N=2, Cin=4, Cout=8, T=8, H=W=16,
    # kernel_size=3, stride=1, padding=1, bias=False.
    key = jax.random.PRNGKey(0)
    kx, kwt = jax.random.split(key)

    N, Cin, Cout = 2, 4, 8
    T, H, W = 8, 16, 16
    kT = kH = kW = 3
    stride = (1, 1, 1)
    padding = (1, 1, 1)

    x = jax.random.normal(kx, (N, Cin, T, H, W), jnp.float32)

    # Deterministic weight init mimicking PyTorch Conv3d default (uniform(-b, b),
    # b = 1/sqrt(fan_in)); no bias (bias=False in the module).
    fan_in = Cin * kT * kH * kW
    bound = 1.0 / math.sqrt(fan_in)
    weight = jax.random.uniform(kwt, (Cout, Cin, kT, kH, kW), jnp.float32,
                                minval=-bound, maxval=bound)

    y = spatio_temporal_conv(x, weight, stride=stride, padding=padding)
    y = jax.block_until_ready(y)

    # Reference: XLA conv on the SAME bf16-quantized inputs (the kernel's data
    # path is bf16 with f32 accumulation), so only summation order differs.
    x_q = x.astype(jnp.bfloat16).astype(jnp.float32)
    w_q = weight.astype(jnp.bfloat16).astype(jnp.float32)
    y_ref = lax.conv_general_dilated(
        x_q, w_q, window_strides=stride,
        padding=[(padding[0], padding[0]), (padding[1], padding[1]),
                 (padding[2], padding[2])],
        dimension_numbers=("NCDHW", "OIDHW", "NCDHW"))

    assert y.shape == y_ref.shape, (y.shape, y_ref.shape)
    assert jnp.allclose(y, y_ref, atol=1e-2, rtol=1e-2), float(
        jnp.max(jnp.abs(y - y_ref)))
    print("KERNEL_OK")
</pallas_src>

<mosaic_0001>
module attributes {stable_mosaic.version = 11 : i64} {
  func.func @_conv3d_kernel(%arg0: i32, %arg1: i32, %arg2: memref<2x10x16x512xbf16, #tpu.memory_space<any>>, %arg3: memref<8x432xbf16, #tpu.memory_space<vmem>>, %arg4: memref<1x1x8x384xf32, #tpu.memory_space<vmem>>, %arg5: memref<4x16x512xbf16, #tpu.memory_space<vmem>>, %arg6: memref<432x384xbf16, #tpu.memory_space<vmem>>, %arg7: memref<4x!tpu.dma_semaphore, #tpu.memory_space<semaphore_mem>>) attributes {dimension_semantics = [#tpu.dimension_semantics<parallel>, #tpu.dimension_semantics<arbitrary>], iteration_bounds = array<i64: 2, 8>, scalar_prefetch = 0 : i64, scratch_operands = 3 : i64, tpu.core_type = #tpu.core_type<tc>, window_params = [{}, {pipeline_mode = #tpu.pipeline_mode<synchronous>, transform_indices = @transform_1, window_bounds = array<i64: 8, 432>}, {transform_indices = @transform_2, window_bounds = array<i64: 1, 1, 8, 384>}]} {
    %c1_i32 = arith.constant 1 : i32
    %0 = arith.muli %arg1, %c1_i32 : i32
    %c0_i32 = arith.constant 0 : i32
    %1 = arith.cmpi eq, %arg1, %c0_i32 : i32
    %2 = arith.extui %1 : i1 to i32
    %c0_i32_0 = arith.constant 0 : i32
    %3 = arith.cmpi ne, %2, %c0_i32_0 : i32
    scf.if %3 {
      %c0_i32_161 = arith.constant 0 : i32
      %161 = arith.addi %0, %c0_i32_161 : i32
      %c4_i32_162 = arith.constant 4 : i32
      %c0_i32_163 = arith.constant 0 : i32
      %162 = arith.cmpi eq, %c4_i32_162, %c0_i32_163 : i32
      %c1_i32_164 = arith.constant 1 : i32
      %163 = arith.select %162, %c1_i32_164, %c4_i32_162 : i32
      %164 = arith.remsi %161, %163 : i32
      %c0_i32_165 = arith.constant 0 : i32
      %165 = arith.cmpi ne, %164, %c0_i32_165 : i32
      %c0_i32_166 = arith.constant 0 : i32
      %166 = arith.cmpi slt, %164, %c0_i32_166 : i32
      %c0_i32_167 = arith.constant 0 : i32
      %167 = arith.cmpi slt, %163, %c0_i32_167 : i32
      %168 = arith.xori %166, %167 : i1
      %169 = arith.andi %168, %165 : i1
      %170 = arith.addi %164, %163 : i32
      %171 = arith.select %169, %170, %164 : i32
      %c0_i32_168 = arith.constant 0 : i32
      %c0_i32_169 = arith.constant 0 : i32
      %172 = tpu.memref_slice %arg2[%arg0, %161, %c0_i32_168, %c0_i32_169] : memref<2x10x16x512xbf16, #tpu.memory_space<any>> -> memref<1x1x16x512xbf16, #tpu.memory_space<any>>
      %173 = tpu.memref_squeeze %172 : memref<1x1x16x512xbf16, #tpu.memory_space<any>> -> memref<16x512xbf16, #tpu.memory_space<any>>
      %c0_i32_170 = arith.constant 0 : i32
      %c0_i32_171 = arith.constant 0 : i32
      %174 = tpu.memref_slice %arg5[%171, %c0_i32_170, %c0_i32_171] : memref<4x16x512xbf16, #tpu.memory_space<vmem>> -> memref<1x16x512xbf16, #tpu.memory_space<vmem>>
      %175 = tpu.memref_squeeze %174 : memref<1x16x512xbf16, #tpu.memory_space<vmem>> -> memref<16x512xbf16, #tpu.memory_space<vmem>>
      %176 = tpu.memref_slice %arg7[%171] : memref<4x!tpu.dma_semaphore, #tpu.memory_space<semaphore_mem>> -> memref<1x!tpu.dma_semaphore, #tpu.memory_space<semaphore_mem>>
      %177 = tpu.memref_squeeze %176 : memref<1x!tpu.dma_semaphore, #tpu.memory_space<semaphore_mem>> -> memref<!tpu.dma_semaphore, #tpu.memory_space<semaphore_mem>>
      tpu.enqueue_dma source(%173 : memref<16x512xbf16, #tpu.memory_space<any>>) target(%175 : memref<16x512xbf16, #tpu.memory_space<vmem>>) target_semaphore(%177 : memref<!tpu.dma_semaphore, #tpu.memory_space<semaphore_mem>>)
      %c1_i32_172 = arith.constant 1 : i32
      %178 = arith.addi %0, %c1_i32_172 : i32
      %c4_i32_173 = arith.constant 4 : i32
      %c0_i32_174 = arith.constant 0 : i32
      %179 = arith.cmpi eq, %c4_i32_173, %c0_i32_174 : i32
      %c1_i32_175 = arith.constant 1 : i32
      %180 = arith.select %179, %c1_i32_175, %c4_i32_173 : i32
      %181 = arith.remsi %178, %180 : i32
      %c0_i32_176 = arith.constant 0 : i32
      %182 = arith.cmpi ne, %181, %c0_i32_176 : i32
      %c0_i32_177 = arith.constant 0 : i32
      %183 = arith.cmpi slt, %181, %c0_i32_177 : i32
      %c0_i32_178 = arith.constant 0 : i32
      %184 = arith.cmpi slt, %180, %c0_i32_178 : i32
      %185 = arith.xori %183, %184 : i1
      %186 = arith.andi %185, %182 : i1
      %187 = arith.addi %181, %180 : i32
      %188 = arith.select %186, %187, %181 : i32
      %c0_i32_179 = arith.constant 0 : i32
      %c0_i32_180 = arith.constant 0 : i32
      %189 = tpu.memref_slice %arg2[%arg0, %178, %c0_i32_179, %c0_i32_180] : memref<2x10x16x512xbf16, #tpu.memory_space<any>> -> memref<1x1x16x512xbf16, #tpu.memory_space<any>>
      %190 = tpu.memref_squeeze %189 : memref<1x1x16x512xbf16, #tpu.memory_space<any>> -> memref<16x512xbf16, #tpu.memory_space<any>>
      %c0_i32_181 = arith.constant 0 : i32
      %c0_i32_182 = arith.constant 0 : i32
      %191 = tpu.memref_slice %arg5[%188, %c0_i32_181, %c0_i32_182] : memref<4x16x512xbf16, #tpu.memory_space<vmem>> -> memref<1x16x512xbf16, #tpu.memory_space<vmem>>
      %192 = tpu.memref_squeeze %191 : memref<1x16x512xbf16, #tpu.memory_space<vmem>> -> memref<16x512xbf16, #tpu.memory_space<vmem>>
      %193 = tpu.memref_slice %arg7[%188] : memref<4x!tpu.dma_semaphore, #tpu.memory_space<semaphore_mem>> -> memref<1x!tpu.dma_semaphore, #tpu.memory_space<semaphore_mem>>
      %194 = tpu.memref_squeeze %193 : memref<1x!tpu.dma_semaphore, #tpu.memory_space<semaphore_mem>> -> memref<!tpu.dma_semaphore, #tpu.memory_space<semaphore_mem>>
      tpu.enqueue_dma source(%190 : memref<16x512xbf16, #tpu.memory_space<any>>) target(%192 : memref<16x512xbf16, #tpu.memory_space<vmem>>) target_semaphore(%194 : memref<!tpu.dma_semaphore, #tpu.memory_space<semaphore_mem>>)
      %c2_i32_183 = arith.constant 2 : i32
      %195 = arith.addi %0, %c2_i32_183 : i32
      %c4_i32_184 = arith.constant 4 : i32
      %c0_i32_185 = arith.constant 0 : i32
      %196 = arith.cmpi eq, %c4_i32_184, %c0_i32_185 : i32
      %c1_i32_186 = arith.constant 1 : i32
      %197 = arith.select %196, %c1_i32_186, %c4_i32_184 : i32
      %198 = arith.remsi %195, %197 : i32
      %c0_i32_187 = arith.constant 0 : i32
      %199 = arith.cmpi ne, %198, %c0_i32_187 : i32
      %c0_i32_188 = arith.constant 0 : i32
      %200 = arith.cmpi slt, %198, %c0_i32_188 : i32
      %c0_i32_189 = arith.constant 0 : i32
      %201 = arith.cmpi slt, %197, %c0_i32_189 : i32
      %202 = arith.xori %200, %201 : i1
      %203 = arith.andi %202, %199 : i1
      %204 = arith.addi %198, %197 : i32
      %205 = arith.select %203, %204, %198 : i32
      %c0_i32_190 = arith.constant 0 : i32
      %c0_i32_191 = arith.constant 0 : i32
      %206 = tpu.memref_slice %arg2[%arg0, %195, %c0_i32_190, %c0_i32_191] : memref<2x10x16x512xbf16, #tpu.memory_space<any>> -> memref<1x1x16x512xbf16, #tpu.memory_space<any>>
      %207 = tpu.memref_squeeze %206 : memref<1x1x16x512xbf16, #tpu.memory_space<any>> -> memref<16x512xbf16, #tpu.memory_space<any>>
      %c0_i32_192 = arith.constant 0 : i32
      %c0_i32_193 = arith.constant 0 : i32
      %208 = tpu.memref_slice %arg5[%205, %c0_i32_192, %c0_i32_193] : memref<4x16x512xbf16, #tpu.memory_space<vmem>> -> memref<1x16x512xbf16, #tpu.memory_space<vmem>>
      %209 = tpu.memref_squeeze %208 : memref<1x16x512xbf16, #tpu.memory_space<vmem>> -> memref<16x512xbf16, #tpu.memory_space<vmem>>
      %210 = tpu.memref_slice %arg7[%205] : memref<4x!tpu.dma_semaphore, #tpu.memory_space<semaphore_mem>> -> memref<1x!tpu.dma_semaphore, #tpu.memory_space<semaphore_mem>>
      %211 = tpu.memref_squeeze %210 : memref<1x!tpu.dma_semaphore, #tpu.memory_space<semaphore_mem>> -> memref<!tpu.dma_semaphore, #tpu.memory_space<semaphore_mem>>
      tpu.enqueue_dma source(%207 : memref<16x512xbf16, #tpu.memory_space<any>>) target(%209 : memref<16x512xbf16, #tpu.memory_space<vmem>>) target_semaphore(%211 : memref<!tpu.dma_semaphore, #tpu.memory_space<semaphore_mem>>)
    } else {
    }
    %c1_i32_1 = arith.constant 1 : i32
    %4 = arith.addi %arg1, %c1_i32_1 : i32
    %c8_i32 = arith.constant 8 : i32
    %5 = arith.cmpi slt, %4, %c8_i32 : i32
    %6 = arith.extui %5 : i1 to i32
    %c0_i32_2 = arith.constant 0 : i32
    %7 = arith.cmpi ne, %6, %c0_i32_2 : i32
    scf.if %7 {
      %c1_i32_161 = arith.constant 1 : i32
      %161 = arith.addi %arg1, %c1_i32_161 : i32
      %c1_i32_162 = arith.constant 1 : i32
      %162 = arith.muli %161, %c1_i32_162 : i32
      %c2_i32_163 = arith.constant 2 : i32
      %163 = arith.addi %162, %c2_i32_163 : i32
      %c0_i32_164 = arith.constant 0 : i32
      %164 = arith.addi %163, %c0_i32_164 : i32
      %c4_i32_165 = arith.constant 4 : i32
      %c0_i32_166 = arith.constant 0 : i32
      %165 = arith.cmpi eq, %c4_i32_165, %c0_i32_166 : i32
      %c1_i32_167 = arith.constant 1 : i32
      %166 = arith.select %165, %c1_i32_167, %c4_i32_165 : i32
      %167 = arith.remsi %164, %166 : i32
      %c0_i32_168 = arith.constant 0 : i32
      %168 = arith.cmpi ne, %167, %c0_i32_168 : i32
      %c0_i32_169 = arith.constant 0 : i32
      %169 = arith.cmpi slt, %167, %c0_i32_169 : i32
      %c0_i32_170 = arith.constant 0 : i32
      %170 = arith.cmpi slt, %166, %c0_i32_170 : i32
      %171 = arith.xori %169, %170 : i1
      %172 = arith.andi %171, %168 : i1
      %173 = arith.addi %167, %166 : i32
      %174 = arith.select %172, %173, %167 : i32
      %c0_i32_171 = arith.constant 0 : i32
      %c0_i32_172 = arith.constant 0 : i32
      %175 = tpu.memref_slice %arg2[%arg0, %164, %c0_i32_171, %c0_i32_172] : memref<2x10x16x512xbf16, #tpu.memory_space<any>> -> memref<1x1x16x512xbf16, #tpu.memory_space<any>>
      %176 = tpu.memref_squeeze %175 : memref<1x1x16x512xbf16, #tpu.memory_space<any>> -> memref<16x512xbf16, #tpu.memory_space<any>>
      %c0_i32_173 = arith.constant 0 : i32
      %c0_i32_174 = arith.constant 0 : i32
      %177 = tpu.memref_slice %arg5[%174, %c0_i32_173, %c0_i32_174] : memref<4x16x512xbf16, #tpu.memory_space<vmem>> -> memref<1x16x512xbf16, #tpu.memory_space<vmem>>
      %178 = tpu.memref_squeeze %177 : memref<1x16x512xbf16, #tpu.memory_space<vmem>> -> memref<16x512xbf16, #tpu.memory_space<vmem>>
      %179 = tpu.memref_slice %arg7[%174] : memref<4x!tpu.dma_semaphore, #tpu.memory_space<semaphore_mem>> -> memref<1x!tpu.dma_semaphore, #tpu.memory_space<semaphore_mem>>
      %180 = tpu.memref_squeeze %179 : memref<1x!tpu.dma_semaphore, #tpu.memory_space<semaphore_mem>> -> memref<!tpu.dma_semaphore, #tpu.memory_space<semaphore_mem>>
      tpu.enqueue_dma source(%176 : memref<16x512xbf16, #tpu.memory_space<any>>) target(%178 : memref<16x512xbf16, #tpu.memory_space<vmem>>) target_semaphore(%180 : memref<!tpu.dma_semaphore, #tpu.memory_space<semaphore_mem>>)
    } else {
    }
    %c0_i32_3 = arith.constant 0 : i32
    %8 = arith.cmpi eq, %arg1, %c0_i32_3 : i32
    %9 = arith.extui %8 : i1 to i32
    %c0_i32_4 = arith.constant 0 : i32
    %10 = arith.cmpi ne, %9, %c0_i32_4 : i32
    scf.if %10 {
      %c0_i32_161 = arith.constant 0 : i32
      %161 = arith.addi %0, %c0_i32_161 : i32
      %c4_i32_162 = arith.constant 4 : i32
      %c0_i32_163 = arith.constant 0 : i32
      %162 = arith.cmpi eq, %c4_i32_162, %c0_i32_163 : i32
      %c1_i32_164 = arith.constant 1 : i32
      %163 = arith.select %162, %c1_i32_164, %c4_i32_162 : i32
      %164 = arith.remsi %161, %163 : i32
      %c0_i32_165 = arith.constant 0 : i32
      %165 = arith.cmpi ne, %164, %c0_i32_165 : i32
      %c0_i32_166 = arith.constant 0 : i32
      %166 = arith.cmpi slt, %164, %c0_i32_166 : i32
      %c0_i32_167 = arith.constant 0 : i32
      %167 = arith.cmpi slt, %163, %c0_i32_167 : i32
      %168 = arith.xori %166, %167 : i1
      %169 = arith.andi %168, %165 : i1
      %170 = arith.addi %164, %163 : i32
      %171 = arith.select %169, %170, %164 : i32
      %c0_i32_168 = arith.constant 0 : i32
      %c0_i32_169 = arith.constant 0 : i32
      %172 = tpu.memref_slice %arg2[%arg0, %161, %c0_i32_168, %c0_i32_169] : memref<2x10x16x512xbf16, #tpu.memory_space<any>> -> memref<1x1x16x512xbf16, #tpu.memory_space<any>>
      %173 = tpu.memref_squeeze %172 : memref<1x1x16x512xbf16, #tpu.memory_space<any>> -> memref<16x512xbf16, #tpu.memory_space<any>>
      %c0_i32_170 = arith.constant 0 : i32
      %c0_i32_171 = arith.constant 0 : i32
      %174 = tpu.memref_slice %arg5[%171, %c0_i32_170, %c0_i32_171] : memref<4x16x512xbf16, #tpu.memory_space<vmem>> -> memref<1x16x512xbf16, #tpu.memory_space<vmem>>
      %175 = tpu.memref_squeeze %174 : memref<1x16x512xbf16, #tpu.memory_space<vmem>> -> memref<16x512xbf16, #tpu.memory_space<vmem>>
      %176 = tpu.memref_slice %arg7[%171] : memref<4x!tpu.dma_semaphore, #tpu.memory_space<semaphore_mem>> -> memref<1x!tpu.dma_semaphore, #tpu.memory_space<semaphore_mem>>
      %177 = tpu.memref_squeeze %176 : memref<1x!tpu.dma_semaphore, #tpu.memory_space<semaphore_mem>> -> memref<!tpu.dma_semaphore, #tpu.memory_space<semaphore_mem>>
      tpu.wait_dma2 semaphore(%177 : memref<!tpu.dma_semaphore, #tpu.memory_space<semaphore_mem>>) src(%173 : memref<16x512xbf16, #tpu.memory_space<any>>) dst(%175 : memref<16x512xbf16, #tpu.memory_space<vmem>>)
      %c1_i32_172 = arith.constant 1 : i32
      %178 = arith.addi %0, %c1_i32_172 : i32
      %c4_i32_173 = arith.constant 4 : i32
      %c0_i32_174 = arith.constant 0 : i32
      %179 = arith.cmpi eq, %c4_i32_173, %c0_i32_174 : i32
      %c1_i32_175 = arith.constant 1 : i32
      %180 = arith.select %179, %c1_i32_175, %c4_i32_173 : i32
      %181 = arith.remsi %178, %180 : i32
      %c0_i32_176 = arith.constant 0 : i32
      %182 = arith.cmpi ne, %181, %c0_i32_176 : i32
      %c0_i32_177 = arith.constant 0 : i32
      %183 = arith.cmpi slt, %181, %c0_i32_177 : i32
      %c0_i32_178 = arith.constant 0 : i32
      %184 = arith.cmpi slt, %180, %c0_i32_178 : i32
      %185 = arith.xori %183, %184 : i1
      %186 = arith.andi %185, %182 : i1
      %187 = arith.addi %181, %180 : i32
      %188 = arith.select %186, %187, %181 : i32
      %c0_i32_179 = arith.constant 0 : i32
      %c0_i32_180 = arith.constant 0 : i32
      %189 = tpu.memref_slice %arg2[%arg0, %178, %c0_i32_179, %c0_i32_180] : memref<2x10x16x512xbf16, #tpu.memory_space<any>> -> memref<1x1x16x512xbf16, #tpu.memory_space<any>>
      %190 = tpu.memref_squeeze %189 : memref<1x1x16x512xbf16, #tpu.memory_space<any>> -> memref<16x512xbf16, #tpu.memory_space<any>>
      %c0_i32_181 = arith.constant 0 : i32
      %c0_i32_182 = arith.constant 0 : i32
      %191 = tpu.memref_slice %arg5[%188, %c0_i32_181, %c0_i32_182] : memref<4x16x512xbf16, #tpu.memory_space<vmem>> -> memref<1x16x512xbf16, #tpu.memory_space<vmem>>
      %192 = tpu.memref_squeeze %191 : memref<1x16x512xbf16, #tpu.memory_space<vmem>> -> memref<16x512xbf16, #tpu.memory_space<vmem>>
      %193 = tpu.memref_slice %arg7[%188] : memref<4x!tpu.dma_semaphore, #tpu.memory_space<semaphore_mem>> -> memref<1x!tpu.dma_semaphore, #tpu.memory_space<semaphore_mem>>
      %194 = tpu.memref_squeeze %193 : memref<1x!tpu.dma_semaphore, #tpu.memory_space<semaphore_mem>> -> memref<!tpu.dma_semaphore, #tpu.memory_space<semaphore_mem>>
      tpu.wait_dma2 semaphore(%194 : memref<!tpu.dma_semaphore, #tpu.memory_space<semaphore_mem>>) src(%190 : memref<16x512xbf16, #tpu.memory_space<any>>) dst(%192 : memref<16x512xbf16, #tpu.memory_space<vmem>>)
      %c2_i32_183 = arith.constant 2 : i32
      %195 = arith.addi %0, %c2_i32_183 : i32
      %c4_i32_184 = arith.constant 4 : i32
      %c0_i32_185 = arith.constant 0 : i32
      %196 = arith.cmpi eq, %c4_i32_184, %c0_i32_185 : i32
      %c1_i32_186 = arith.constant 1 : i32
      %197 = arith.select %196, %c1_i32_186, %c4_i32_184 : i32
      %198 = arith.remsi %195, %197 : i32
      %c0_i32_187 = arith.constant 0 : i32
      %199 = arith.cmpi ne, %198, %c0_i32_187 : i32
      %c0_i32_188 = arith.constant 0 : i32
      %200 = arith.cmpi slt, %198, %c0_i32_188 : i32
      %c0_i32_189 = arith.constant 0 : i32
      %201 = arith.cmpi slt, %197, %c0_i32_189 : i32
      %202 = arith.xori %200, %201 : i1
      %203 = arith.andi %202, %199 : i1
      %204 = arith.addi %198, %197 : i32
      %205 = arith.select %203, %204, %198 : i32
      %c0_i32_190 = arith.constant 0 : i32
      %c0_i32_191 = arith.constant 0 : i32
      %206 = tpu.memref_slice %arg2[%arg0, %195, %c0_i32_190, %c0_i32_191] : memref<2x10x16x512xbf16, #tpu.memory_space<any>> -> memref<1x1x16x512xbf16, #tpu.memory_space<any>>
      %207 = tpu.memref_squeeze %206 : memref<1x1x16x512xbf16, #tpu.memory_space<any>> -> memref<16x512xbf16, #tpu.memory_space<any>>
      %c0_i32_192 = arith.constant 0 : i32
      %c0_i32_193 = arith.constant 0 : i32
      %208 = tpu.memref_slice %arg5[%205, %c0_i32_192, %c0_i32_193] : memref<4x16x512xbf16, #tpu.memory_space<vmem>> -> memref<1x16x512xbf16, #tpu.memory_space<vmem>>
      %209 = tpu.memref_squeeze %208 : memref<1x16x512xbf16, #tpu.memory_space<vmem>> -> memref<16x512xbf16, #tpu.memory_space<vmem>>
      %210 = tpu.memref_slice %arg7[%205] : memref<4x!tpu.dma_semaphore, #tpu.memory_space<semaphore_mem>> -> memref<1x!tpu.dma_semaphore, #tpu.memory_space<semaphore_mem>>
      %211 = tpu.memref_squeeze %210 : memref<1x!tpu.dma_semaphore, #tpu.memory_space<semaphore_mem>> -> memref<!tpu.dma_semaphore, #tpu.memory_space<semaphore_mem>>
      tpu.wait_dma2 semaphore(%211 : memref<!tpu.dma_semaphore, #tpu.memory_space<semaphore_mem>>) src(%207 : memref<16x512xbf16, #tpu.memory_space<any>>) dst(%209 : memref<16x512xbf16, #tpu.memory_space<vmem>>)
    } else {
    }
    %c0_i32_5 = arith.constant 0 : i32
    %11 = arith.cmpi sgt, %arg1, %c0_i32_5 : i32
    %12 = arith.extui %11 : i1 to i32
    %c0_i32_6 = arith.constant 0 : i32
    %13 = arith.cmpi ne, %12, %c0_i32_6 : i32
    scf.if %13 {
      %c2_i32_161 = arith.constant 2 : i32
      %161 = arith.addi %0, %c2_i32_161 : i32
      %c0_i32_162 = arith.constant 0 : i32
      %162 = arith.addi %161, %c0_i32_162 : i32
      %c4_i32_163 = arith.constant 4 : i32
      %c0_i32_164 = arith.constant 0 : i32
      %163 = arith.cmpi eq, %c4_i32_163, %c0_i32_164 : i32
      %c1_i32_165 = arith.constant 1 : i32
      %164 = arith.select %163, %c1_i32_165, %c4_i32_163 : i32
      %165 = arith.remsi %162, %164 : i32
      %c0_i32_166 = arith.constant 0 : i32
      %166 = arith.cmpi ne, %165, %c0_i32_166 : i32
      %c0_i32_167 = arith.constant 0 : i32
      %167 = arith.cmpi slt, %165, %c0_i32_167 : i32
      %c0_i32_168 = arith.constant 0 : i32
      %168 = arith.cmpi slt, %164, %c0_i32_168 : i32
      %169 = arith.xori %167, %168 : i1
      %170 = arith.andi %169, %166 : i1
      %171 = arith.addi %165, %164 : i32
      %172 = arith.select %170, %171, %165 : i32
      %c0_i32_169 = arith.constant 0 : i32
      %c0_i32_170 = arith.constant 0 : i32
      %173 = tpu.memref_slice %arg2[%arg0, %162, %c0_i32_169, %c0_i32_170] : memref<2x10x16x512xbf16, #tpu.memory_space<any>> -> memref<1x1x16x512xbf16, #tpu.memory_space<any>>
      %174 = tpu.memref_squeeze %173 : memref<1x1x16x512xbf16, #tpu.memory_space<any>> -> memref<16x512xbf16, #tpu.memory_space<any>>
      %c0_i32_171 = arith.constant 0 : i32
      %c0_i32_172 = arith.constant 0 : i32
      %175 = tpu.memref_slice %arg5[%172, %c0_i32_171, %c0_i32_172] : memref<4x16x512xbf16, #tpu.memory_space<vmem>> -> memref<1x16x512xbf16, #tpu.memory_space<vmem>>
      %176 = tpu.memref_squeeze %175 : memref<1x16x512xbf16, #tpu.memory_space<vmem>> -> memref<16x512xbf16, #tpu.memory_space<vmem>>
      %177 = tpu.memref_slice %arg7[%172] : memref<4x!tpu.dma_semaphore, #tpu.memory_space<semaphore_mem>> -> memref<1x!tpu.dma_semaphore, #tpu.memory_space<semaphore_mem>>
      %178 = tpu.memref_squeeze %177 : memref<1x!tpu.dma_semaphore, #tpu.memory_space<semaphore_mem>> -> memref<!tpu.dma_semaphore, #tpu.memory_space<semaphore_mem>>
      tpu.wait_dma2 semaphore(%178 : memref<!tpu.dma_semaphore, #tpu.memory_space<semaphore_mem>>) src(%174 : memref<16x512xbf16, #tpu.memory_space<any>>) dst(%176 : memref<16x512xbf16, #tpu.memory_space<vmem>>)
    } else {
    }
    %c0_i32_7 = arith.constant 0 : i32
    %14 = arith.addi %0, %c0_i32_7 : i32
    %c4_i32 = arith.constant 4 : i32
    %c0_i32_8 = arith.constant 0 : i32
    %15 = arith.cmpi eq, %c4_i32, %c0_i32_8 : i32
    %c1_i32_9 = arith.constant 1 : i32
    %16 = arith.select %15, %c1_i32_9, %c4_i32 : i32
    %17 = arith.remsi %14, %16 : i32
    %c0_i32_10 = arith.constant 0 : i32
    %18 = arith.cmpi ne, %17, %c0_i32_10 : i32
    %c0_i32_11 = arith.constant 0 : i32
    %19 = arith.cmpi slt, %17, %c0_i32_11 : i32
    %c0_i32_12 = arith.constant 0 : i32
    %20 = arith.cmpi slt, %16, %c0_i32_12 : i32
    %21 = arith.xori %19, %20 : i1
    %22 = arith.andi %21, %18 : i1
    %23 = arith.addi %17, %16 : i32
    %24 = arith.select %22, %23, %17 : i32
    %c0_i32_13 = arith.constant 0 : i32
    %c0_i32_14 = arith.constant 0 : i32
    %25 = tpu.memref_slice %arg5[%24, %c0_i32_13, %c0_i32_14] : memref<4x16x512xbf16, #tpu.memory_space<vmem>> -> memref<1x16x512xbf16, #tpu.memory_space<vmem>>
    %26 = tpu.memref_squeeze %25 : memref<1x16x512xbf16, #tpu.memory_space<vmem>> -> memref<16x512xbf16, #tpu.memory_space<vmem>>
    %c0 = arith.constant 0 : index
    %c0_15 = arith.constant 0 : index
    %27 = vector.load %26[%c0, %c0_15] : memref<16x512xbf16, #tpu.memory_space<vmem>>, vector<16x384xbf16>
    %c0_16 = arith.constant 0 : index
    %c0_17 = arith.constant 0 : index
    %28 = vector.load %arg6[%c0_16, %c0_17] : memref<432x384xbf16, #tpu.memory_space<vmem>>, vector<16x384xbf16>
    tpu.vector_store %arg6[%c0_16, %c0_17], %27 {strides = array<i32>} : memref<432x384xbf16, #tpu.memory_space<vmem>>, vector<16x384xbf16>,
    %c0_i32_18 = arith.constant 0 : i32
    %c0_i32_19 = arith.constant 0 : i32
    %29 = tpu.memref_slice %arg5[%24, %c0_i32_18, %c0_i32_19] : memref<4x16x512xbf16, #tpu.memory_space<vmem>> -> memref<1x16x512xbf16, #tpu.memory_space<vmem>>
    %30 = tpu.memref_squeeze %29 : memref<1x16x512xbf16, #tpu.memory_space<vmem>> -> memref<16x512xbf16, #tpu.memory_space<vmem>>
    %c0_20 = arith.constant 0 : index
    %c1 = arith.constant 1 : index
    %31 = vector.load %30[%c0_20, %c1] : memref<16x512xbf16, #tpu.memory_space<vmem>>, vector<16x384xbf16>
    %c16 = arith.constant 16 : index
    %c0_21 = arith.constant 0 : index
    %32 = vector.load %arg6[%c16, %c0_21] : memref<432x384xbf16, #tpu.memory_space<vmem>>, vector<16x384xbf16>
    tpu.vector_store %arg6[%c16, %c0_21], %31 {strides = array<i32>} : memref<432x384xbf16, #tpu.memory_space<vmem>>, vector<16x384xbf16>,
    %c0_i32_22 = arith.constant 0 : i32
    %c0_i32_23 = arith.constant 0 : i32
    %33 = tpu.memref_slice %arg5[%24, %c0_i32_22, %c0_i32_23] : memref<4x16x512xbf16, #tpu.memory_space<vmem>> -> memref<1x16x512xbf16, #tpu.memory_space<vmem>>
    %34 = tpu.memref_squeeze %33 : memref<1x16x512xbf16, #tpu.memory_space<vmem>> -> memref<16x512xbf16, #tpu.memory_space<vmem>>
    %c0_24 = arith.constant 0 : index
    %c2 = arith.constant 2 : index
    %35 = vector.load %34[%c0_24, %c2] : memref<16x512xbf16, #tpu.memory_space<vmem>>, vector<16x384xbf16>
    %c32 = arith.constant 32 : index
    %c0_25 = arith.constant 0 : index
    %36 = vector.load %arg6[%c32, %c0_25] : memref<432x384xbf16, #tpu.memory_space<vmem>>, vector<16x384xbf16>
    tpu.vector_store %arg6[%c32, %c0_25], %35 {strides = array<i32>} : memref<432x384xbf16, #tpu.memory_space<vmem>>, vector<16x384xbf16>,
    %c0_i32_26 = arith.constant 0 : i32
    %c0_i32_27 = arith.constant 0 : i32
    %37 = tpu.memref_slice %arg5[%24, %c0_i32_26, %c0_i32_27] : memref<4x16x512xbf16, #tpu.memory_space<vmem>> -> memref<1x16x512xbf16, #tpu.memory_space<vmem>>
    %38 = tpu.memref_squeeze %37 : memref<1x16x512xbf16, #tpu.memory_space<vmem>> -> memref<16x512xbf16, #tpu.memory_space<vmem>>
    %c0_28 = arith.constant 0 : index
    %c18 = arith.constant 18 : index
    %39 = vector.load %38[%c0_28, %c18] : memref<16x512xbf16, #tpu.memory_space<vmem>>, vector<16x384xbf16>
    %c48 = arith.constant 48 : index
    %c0_29 = arith.constant 0 : index
    %40 = vector.load %arg6[%c48, %c0_29] : memref<432x384xbf16, #tpu.memory_space<vmem>>, vector<16x384xbf16>
    tpu.vector_store %arg6[%c48, %c0_29], %39 {strides = array<i32>} : memref<432x384xbf16, #tpu.memory_space<vmem>>, vector<16x384xbf16>,
    %c0_i32_30 = arith.constant 0 : i32
    %c0_i32_31 = arith.constant 0 : i32
    %41 = tpu.memref_slice %arg5[%24, %c0_i32_30, %c0_i32_31] : memref<4x16x512xbf16, #tpu.memory_space<vmem>> -> memref<1x16x512xbf16, #tpu.memory_space<vmem>>
    %42 = tpu.memref_squeeze %41 : memref<1x16x512xbf16, #tpu.memory_space<vmem>> -> memref<16x512xbf16, #tpu.memory_space<vmem>>
    %c0_32 = arith.constant 0 : index
    %c19 = arith.constant 19 : index
    %43 = vector.load %42[%c0_32, %c19] : memref<16x512xbf16, #tpu.memory_space<vmem>>, vector<16x384xbf16>
    %c64 = arith.constant 64 : index
    %c0_33 = arith.constant 0 : index
    %44 = vector.load %arg6[%c64, %c0_33] : memref<432x384xbf16, #tpu.memory_space<vmem>>, vector<16x384xbf16>
    tpu.vector_store %arg6[%c64, %c0_33], %43 {strides = array<i32>} : memref<432x384xbf16, #tpu.memory_space<vmem>>, vector<16x384xbf16>,
    %c0_i32_34 = arith.constant 0 : i32
    %c0_i32_35 = arith.constant 0 : i32
    %45 = tpu.memref_slice %arg5[%24, %c0_i32_34, %c0_i32_35] : memref<4x16x512xbf16, #tpu.memory_space<vmem>> -> memref<1x16x512xbf16, #tpu.memory_space<vmem>>
    %46 = tpu.memref_squeeze %45 : memref<1x16x512xbf16, #tpu.memory_space<vmem>> -> memref<16x512xbf16, #tpu.memory_space<vmem>>
    %c0_36 = arith.constant 0 : index
    %c20 = arith.constant 20 : index
    %47 = vector.load %46[%c0_36, %c20] : memref<16x512xbf16, #tpu.memory_space<vmem>>, vector<16x384xbf16>
    %c80 = arith.constant 80 : index
    %c0_37 = arith.constant 0 : index
    %48 = vector.load %arg6[%c80, %c0_37] : memref<432x384xbf16, #tpu.memory_space<vmem>>, vector<16x384xbf16>
    tpu.vector_store %arg6[%c80, %c0_37], %47 {strides = array<i32>} : memref<432x384xbf16, #tpu.memory_space<vmem>>, vector<16x384xbf16>,
    %c0_i32_38 = arith.constant 0 : i32
    %c0_i32_39 = arith.constant 0 : i32
    %49 = tpu.memref_slice %arg5[%24, %c0_i32_38, %c0_i32_39] : memref<4x16x512xbf16, #tpu.memory_space<vmem>> -> memref<1x16x512xbf16, #tpu.memory_space<vmem>>
    %50 = tpu.memref_squeeze %49 : memref<1x16x512xbf16, #tpu.memory_space<vmem>> -> memref<16x512xbf16, #tpu.memory_space<vmem>>
    %c0_40 = arith.constant 0 : index
    %c36 = arith.constant 36 : index
    %51 = vector.load %50[%c0_40, %c36] : memref<16x512xbf16, #tpu.memory_space<vmem>>, vector<16x384xbf16>
    %c96 = arith.constant 96 : index
    %c0_41 = arith.constant 0 : index
    %52 = vector.load %arg6[%c96, %c0_41] : memref<432x384xbf16, #tpu.memory_space<vmem>>, vector<16x384xbf16>
    tpu.vector_store %arg6[%c96, %c0_41], %51 {strides = array<i32>} : memref<432x384xbf16, #tpu.memory_space<vmem>>, vector<16x384xbf16>,
    %c0_i32_42 = arith.constant 0 : i32
    %c0_i32_43 = arith.constant 0 : i32
    %53 = tpu.memref_slice %arg5[%24, %c0_i32_42, %c0_i32_43] : memref<4x16x512xbf16, #tpu.memory_space<vmem>> -> memref<1x16x512xbf16, #tpu.memory_space<vmem>>
    %54 = tpu.memref_squeeze %53 : memref<1x16x512xbf16, #tpu.memory_space<vmem>> -> memref<16x512xbf16, #tpu.memory_space<vmem>>
    %c0_44 = arith.constant 0 : index
    %c37 = arith.constant 37 : index
    %55 = vector.load %54[%c0_44, %c37] : memref<16x512xbf16, #tpu.memory_space<vmem>>, vector<16x384xbf16>
    %c112 = arith.constant 112 : index
    %c0_45 = arith.constant 0 : index
    %56 = vector.load %arg6[%c112, %c0_45] : memref<432x384xbf16, #tpu.memory_space<vmem>>, vector<16x384xbf16>
    tpu.vector_store %arg6[%c112, %c0_45], %55 {strides = array<i32>} : memref<432x384xbf16, #tpu.memory_space<vmem>>, vector<16x384xbf16>,
    %c0_i32_46 = arith.constant 0 : i32
    %c0_i32_47 = arith.constant 0 : i32
    %57 = tpu.memref_slice %arg5[%24, %c0_i32_46, %c0_i32_47] : memref<4x16x512xbf16, #tpu.memory_space<vmem>> -> memref<1x16x512xbf16, #tpu.memory_space<vmem>>
    %58 = tpu.memref_squeeze %57 : memref<1x16x512xbf16, #tpu.memory_space<vmem>> -> memref<16x512xbf16, #tpu.memory_space<vmem>>
    %c0_48 = arith.constant 0 : index
    %c38 = arith.constant 38 : index
    %59 = vector.load %58[%c0_48, %c38] : memref<16x512xbf16, #tpu.memory_space<vmem>>, vector<16x384xbf16>
    %c128 = arith.constant 128 : index
    %c0_49 = arith.constant 0 : index
    %60 = vector.load %arg6[%c128, %c0_49] : memref<432x384xbf16, #tpu.memory_space<vmem>>, vector<16x384xbf16>
    tpu.vector_store %arg6[%c128, %c0_49], %59 {strides = array<i32>} : memref<432x384xbf16, #tpu.memory_space<vmem>>, vector<16x384xbf16>,
    %c1_i32_50 = arith.constant 1 : i32
    %61 = arith.addi %0, %c1_i32_50 : i32
    %c4_i32_51 = arith.constant 4 : i32
    %c0_i32_52 = arith.constant 0 : i32
    %62 = arith.cmpi eq, %c4_i32_51, %c0_i32_52 : i32
    %c1_i32_53 = arith.constant 1 : i32
    %63 = arith.select %62, %c1_i32_53, %c4_i32_51 : i32
    %64 = arith.remsi %61, %63 : i32
    %c0_i32_54 = arith.constant 0 : i32
    %65 = arith.cmpi ne, %64, %c0_i32_54 : i32
    %c0_i32_55 = arith.constant 0 : i32
    %66 = arith.cmpi slt, %64, %c0_i32_55 : i32
    %c0_i32_56 = arith.constant 0 : i32
    %67 = arith.cmpi slt, %63, %c0_i32_56 : i32
    %68 = arith.xori %66, %67 : i1
    %69 = arith.andi %68, %65 : i1
    %70 = arith.addi %64, %63 : i32
    %71 = arith.select %69, %70, %64 : i32
    %c0_i32_57 = arith.constant 0 : i32
    %c0_i32_58 = arith.constant 0 : i32
    %72 = tpu.memref_slice %arg5[%71, %c0_i32_57, %c0_i32_58] : memref<4x16x512xbf16, #tpu.memory_space<vmem>> -> memref<1x16x512xbf16, #tpu.memory_space<vmem>>
    %73 = tpu.memref_squeeze %72 : memref<1x16x512xbf16, #tpu.memory_space<vmem>> -> memref<16x512xbf16, #tpu.memory_space<vmem>>
    %c0_59 = arith.constant 0 : index
    %c0_60 = arith.constant 0 : index
    %74 = vector.load %73[%c0_59, %c0_60] : memref<16x512xbf16, #tpu.memory_space<vmem>>, vector<16x384xbf16>
    %c144 = arith.constant 144 : index
    %c0_61 = arith.constant 0 : index
    %75 = vector.load %arg6[%c144, %c0_61] : memref<432x384xbf16, #tpu.memory_space<vmem>>, vector<16x384xbf16>
    tpu.vector_store %arg6[%c144, %c0_61], %74 {strides = array<i32>} : memref<432x384xbf16, #tpu.memory_space<vmem>>, vector<16x384xbf16>,
    %c0_i32_62 = arith.constant 0 : i32
    %c0_i32_63 = arith.constant 0 : i32
    %76 = tpu.memref_slice %arg5[%71, %c0_i32_62, %c0_i32_63] : memref<4x16x512xbf16, #tpu.memory_space<vmem>> -> memref<1x16x512xbf16, #tpu.memory_space<vmem>>
    %77 = tpu.memref_squeeze %76 : memref<1x16x512xbf16, #tpu.memory_space<vmem>> -> memref<16x512xbf16, #tpu.memory_space<vmem>>
    %c0_64 = arith.constant 0 : index
    %c1_65 = arith.constant 1 : index
    %78 = vector.load %77[%c0_64, %c1_65] : memref<16x512xbf16, #tpu.memory_space<vmem>>, vector<16x384xbf16>
    %c160 = arith.constant 160 : index
    %c0_66 = arith.constant 0 : index
    %79 = vector.load %arg6[%c160, %c0_66] : memref<432x384xbf16, #tpu.memory_space<vmem>>, vector<16x384xbf16>
    tpu.vector_store %arg6[%c160, %c0_66], %78 {strides = array<i32>} : memref<432x384xbf16, #tpu.memory_space<vmem>>, vector<16x384xbf16>,
    %c0_i32_67 = arith.constant 0 : i32
    %c0_i32_68 = arith.constant 0 : i32
    %80 = tpu.memref_slice %arg5[%71, %c0_i32_67, %c0_i32_68] : memref<4x16x512xbf16, #tpu.memory_space<vmem>> -> memref<1x16x512xbf16, #tpu.memory_space<vmem>>
    %81 = tpu.memref_squeeze %80 : memref<1x16x512xbf16, #tpu.memory_space<vmem>> -> memref<16x512xbf16, #tpu.memory_space<vmem>>
    %c0_69 = arith.constant 0 : index
    %c2_70 = arith.constant 2 : index
    %82 = vector.load %81[%c0_69, %c2_70] : memref<16x512xbf16, #tpu.memory_space<vmem>>, vector<16x384xbf16>
    %c176 = arith.constant 176 : index
    %c0_71 = arith.constant 0 : index
    %83 = vector.load %arg6[%c176, %c0_71] : memref<432x384xbf16, #tpu.memory_space<vmem>>, vector<16x384xbf16>
    tpu.vector_store %arg6[%c176, %c0_71], %82 {strides = array<i32>} : memref<432x384xbf16, #tpu.memory_space<vmem>>, vector<16x384xbf16>,
    %c0_i32_72 = arith.constant 0 : i32
    %c0_i32_73 = arith.constant 0 : i32
    %84 = tpu.memref_slice %arg5[%71, %c0_i32_72, %c0_i32_73] : memref<4x16x512xbf16, #tpu.memory_space<vmem>> -> memref<1x16x512xbf16, #tpu.memory_space<vmem>>
    %85 = tpu.memref_squeeze %84 : memref<1x16x512xbf16, #tpu.memory_space<vmem>> -> memref<16x512xbf16, #tpu.memory_space<vmem>>
    %c0_74 = arith.constant 0 : index
    %c18_75 = arith.constant 18 : index
    %86 = vector.load %85[%c0_74, %c18_75] : memref<16x512xbf16, #tpu.memory_space<vmem>>, vector<16x384xbf16>
    %c192 = arith.constant 192 : index
    %c0_76 = arith.constant 0 : index
    %87 = vector.load %arg6[%c192, %c0_76] : memref<432x384xbf16, #tpu.memory_space<vmem>>, vector<16x384xbf16>
    tpu.vector_store %arg6[%c192, %c0_76], %86 {strides = array<i32>} : memref<432x384xbf16, #tpu.memory_space<vmem>>, vector<16x384xbf16>,
    %c0_i32_77 = arith.constant 0 : i32
    %c0_i32_78 = arith.constant 0 : i32
    %88 = tpu.memref_slice %arg5[%71, %c0_i32_77, %c0_i32_78] : memref<4x16x512xbf16, #tpu.memory_space<vmem>> -> memref<1x16x512xbf16, #tpu.memory_space<vmem>>
    %89 = tpu.memref_squeeze %88 : memref<1x16x512xbf16, #tpu.memory_space<vmem>> -> memref<16x512xbf16, #tpu.memory_space<vmem>>
    %c0_79 = arith.constant 0 : index
    %c19_80 = arith.constant 19 : index
    %90 = vector.load %89[%c0_79, %c19_80] : memref<16x512xbf16, #tpu.memory_space<vmem>>, vector<16x384xbf16>
    %c208 = arith.constant 208 : index
    %c0_81 = arith.constant 0 : index
    %91 = vector.load %arg6[%c208, %c0_81] : memref<432x384xbf16, #tpu.memory_space<vmem>>, vector<16x384xbf16>
    tpu.vector_store %arg6[%c208, %c0_81], %90 {strides = array<i32>} : memref<432x384xbf16, #tpu.memory_space<vmem>>, vector<16x384xbf16>,
    %c0_i32_82 = arith.constant 0 : i32
    %c0_i32_83 = arith.constant 0 : i32
    %92 = tpu.memref_slice %arg5[%71, %c0_i32_82, %c0_i32_83] : memref<4x16x512xbf16, #tpu.memory_space<vmem>> -> memref<1x16x512xbf16, #tpu.memory_space<vmem>>
    %93 = tpu.memref_squeeze %92 : memref<1x16x512xbf16, #tpu.memory_space<vmem>> -> memref<16x512xbf16, #tpu.memory_space<vmem>>
    %c0_84 = arith.constant 0 : index
    %c20_85 = arith.constant 20 : index
    %94 = vector.load %93[%c0_84, %c20_85] : memref<16x512xbf16, #tpu.memory_space<vmem>>, vector<16x384xbf16>
    %c224 = arith.constant 224 : index
    %c0_86 = arith.constant 0 : index
    %95 = vector.load %arg6[%c224, %c0_86] : memref<432x384xbf16, #tpu.memory_space<vmem>>, vector<16x384xbf16>
    tpu.vector_store %arg6[%c224, %c0_86], %94 {strides = array<i32>} : memref<432x384xbf16, #tpu.memory_space<vmem>>, vector<16x384xbf16>,
    %c0_i32_87 = arith.constant 0 : i32
    %c0_i32_88 = arith.constant 0 : i32
    %96 = tpu.memref_slice %arg5[%71, %c0_i32_87, %c0_i32_88] : memref<4x16x512xbf16, #tpu.memory_space<vmem>> -> memref<1x16x512xbf16, #tpu.memory_space<vmem>>
    %97 = tpu.memref_squeeze %96 : memref<1x16x512xbf16, #tpu.memory_space<vmem>> -> memref<16x512xbf16, #tpu.memory_space<vmem>>
    %c0_89 = arith.constant 0 : index
    %c36_90 = arith.constant 36 : index
    %98 = vector.load %97[%c0_89, %c36_90] : memref<16x512xbf16, #tpu.memory_space<vmem>>, vector<16x384xbf16>
    %c240 = arith.constant 240 : index
    %c0_91 = arith.constant 0 : index
    %99 = vector.load %arg6[%c240, %c0_91] : memref<432x384xbf16, #tpu.memory_space<vmem>>, vector<16x384xbf16>
    tpu.vector_store %arg6[%c240, %c0_91], %98 {strides = array<i32>} : memref<432x384xbf16, #tpu.memory_space<vmem>>, vector<16x384xbf16>,
    %c0_i32_92 = arith.constant 0 : i32
    %c0_i32_93 = arith.constant 0 : i32
    %100 = tpu.memref_slice %arg5[%71, %c0_i32_92, %c0_i32_93] : memref<4x16x512xbf16, #tpu.memory_space<vmem>> -> memref<1x16x512xbf16, #tpu.memory_space<vmem>>
    %101 = tpu.memref_squeeze %100 : memref<1x16x512xbf16, #tpu.memory_space<vmem>> -> memref<16x512xbf16, #tpu.memory_space<vmem>>
    %c0_94 = arith.constant 0 : index
    %c37_95 = arith.constant 37 : index
    %102 = vector.load %101[%c0_94, %c37_95] : memref<16x512xbf16, #tpu.memory_space<vmem>>, vector<16x384xbf16>
    %c256 = arith.constant 256 : index
    %c0_96 = arith.constant 0 : index
    %103 = vector.load %arg6[%c256, %c0_96] : memref<432x384xbf16, #tpu.memory_space<vmem>>, vector<16x384xbf16>
    tpu.vector_store %arg6[%c256, %c0_96], %102 {strides = array<i32>} : memref<432x384xbf16, #tpu.memory_space<vmem>>, vector<16x384xbf16>,
    %c0_i32_97 = arith.constant 0 : i32
    %c0_i32_98 = arith.constant 0 : i32
    %104 = tpu.memref_slice %arg5[%71, %c0_i32_97, %c0_i32_98] : memref<4x16x512xbf16, #tpu.memory_space<vmem>> -> memref<1x16x512xbf16, #tpu.memory_space<vmem>>
    %105 = tpu.memref_squeeze %104 : memref<1x16x512xbf16, #tpu.memory_space<vmem>> -> memref<16x512xbf16, #tpu.memory_space<vmem>>
    %c0_99 = arith.constant 0 : index
    %c38_100 = arith.constant 38 : index
    %106 = vector.load %105[%c0_99, %c38_100] : memref<16x512xbf16, #tpu.memory_space<vmem>>, vector<16x384xbf16>
    %c272 = arith.constant 272 : index
    %c0_101 = arith.constant 0 : index
    %107 = vector.load %arg6[%c272, %c0_101] : memref<432x384xbf16, #tpu.memory_space<vmem>>, vector<16x384xbf16>
    tpu.vector_store %arg6[%c272, %c0_101], %106 {strides = array<i32>} : memref<432x384xbf16, #tpu.memory_space<vmem>>, vector<16x384xbf16>,
    %c2_i32 = arith.constant 2 : i32
    %108 = arith.addi %0, %c2_i32 : i32
    %c4_i32_102 = arith.constant 4 : i32
    %c0_i32_103 = arith.constant 0 : i32
    %109 = arith.cmpi eq, %c4_i32_102, %c0_i32_103 : i32
    %c1_i32_104 = arith.constant 1 : i32
    %110 = arith.select %109, %c1_i32_104, %c4_i32_102 : i32
    %111 = arith.remsi %108, %110 : i32
    %c0_i32_105 = arith.constant 0 : i32
    %112 = arith.cmpi ne, %111, %c0_i32_105 : i32
    %c0_i32_106 = arith.constant 0 : i32
    %113 = arith.cmpi slt, %111, %c0_i32_106 : i32
    %c0_i32_107 = arith.constant 0 : i32
    %114 = arith.cmpi slt, %110, %c0_i32_107 : i32
    %115 = arith.xori %113, %114 : i1
    %116 = arith.andi %115, %112 : i1
    %117 = arith.addi %111, %110 : i32
    %118 = arith.select %116, %117, %111 : i32
    %c0_i32_108 = arith.constant 0 : i32
    %c0_i32_109 = arith.constant 0 : i32
    %119 = tpu.memref_slice %arg5[%118, %c0_i32_108, %c0_i32_109] : memref<4x16x512xbf16, #tpu.memory_space<vmem>> -> memref<1x16x512xbf16, #tpu.memory_space<vmem>>
    %120 = tpu.memref_squeeze %119 : memref<1x16x512xbf16, #tpu.memory_space<vmem>> -> memref<16x512xbf16, #tpu.memory_space<vmem>>
    %c0_110 = arith.constant 0 : index
    %c0_111 = arith.constant 0 : index
    %121 = vector.load %120[%c0_110, %c0_111] : memref<16x512xbf16, #tpu.memory_space<vmem>>, vector<16x384xbf16>
    %c288 = arith.constant 288 : index
    %c0_112 = arith.constant 0 : index
    %122 = vector.load %arg6[%c288, %c0_112] : memref<432x384xbf16, #tpu.memory_space<vmem>>, vector<16x384xbf16>
    tpu.vector_store %arg6[%c288, %c0_112], %121 {strides = array<i32>} : memref<432x384xbf16, #tpu.memory_space<vmem>>, vector<16x384xbf16>,
    %c0_i32_113 = arith.constant 0 : i32
    %c0_i32_114 = arith.constant 0 : i32
    %123 = tpu.memref_slice %arg5[%118, %c0_i32_113, %c0_i32_114] : memref<4x16x512xbf16, #tpu.memory_space<vmem>> -> memref<1x16x512xbf16, #tpu.memory_space<vmem>>
    %124 = tpu.memref_squeeze %123 : memref<1x16x512xbf16, #tpu.memory_space<vmem>> -> memref<16x512xbf16, #tpu.memory_space<vmem>>
    %c0_115 = arith.constant 0 : index
    %c1_116 = arith.constant 1 : index
    %125 = vector.load %124[%c0_115, %c1_116] : memref<16x512xbf16, #tpu.memory_space<vmem>>, vector<16x384xbf16>
    %c304 = arith.constant 304 : index
    %c0_117 = arith.constant 0 : index
    %126 = vector.load %arg6[%c304, %c0_117] : memref<432x384xbf16, #tpu.memory_space<vmem>>, vector<16x384xbf16>
    tpu.vector_store %arg6[%c304, %c0_117], %125 {strides = array<i32>} : memref<432x384xbf16, #tpu.memory_space<vmem>>, vector<16x384xbf16>,
    %c0_i32_118 = arith.constant 0 : i32
    %c0_i32_119 = arith.constant 0 : i32
    %127 = tpu.memref_slice %arg5[%118, %c0_i32_118, %c0_i32_119] : memref<4x16x512xbf16, #tpu.memory_space<vmem>> -> memref<1x16x512xbf16, #tpu.memory_space<vmem>>
    %128 = tpu.memref_squeeze %127 : memref<1x16x512xbf16, #tpu.memory_space<vmem>> -> memref<16x512xbf16, #tpu.memory_space<vmem>>
    %c0_120 = arith.constant 0 : index
    %c2_121 = arith.constant 2 : index
    %129 = vector.load %128[%c0_120, %c2_121] : memref<16x512xbf16, #tpu.memory_space<vmem>>, vector<16x384xbf16>
    %c320 = arith.constant 320 : index
    %c0_122 = arith.constant 0 : index
    %130 = vector.load %arg6[%c320, %c0_122] : memref<432x384xbf16, #tpu.memory_space<vmem>>, vector<16x384xbf16>
    tpu.vector_store %arg6[%c320, %c0_122], %129 {strides = array<i32>} : memref<432x384xbf16, #tpu.memory_space<vmem>>, vector<16x384xbf16>,
    %c0_i32_123 = arith.constant 0 : i32
    %c0_i32_124 = arith.constant 0 : i32
    %131 = tpu.memref_slice %arg5[%118, %c0_i32_123, %c0_i32_124] : memref<4x16x512xbf16, #tpu.memory_space<vmem>> -> memref<1x16x512xbf16, #tpu.memory_space<vmem>>
    %132 = tpu.memref_squeeze %131 : memref<1x16x512xbf16, #tpu.memory_space<vmem>> -> memref<16x512xbf16, #tpu.memory_space<vmem>>
    %c0_125 = arith.constant 0 : index
    %c18_126 = arith.constant 18 : index
    %133 = vector.load %132[%c0_125, %c18_126] : memref<16x512xbf16, #tpu.memory_space<vmem>>, vector<16x384xbf16>
    %c336 = arith.constant 336 : index
    %c0_127 = arith.constant 0 : index
    %134 = vector.load %arg6[%c336, %c0_127] : memref<432x384xbf16, #tpu.memory_space<vmem>>, vector<16x384xbf16>
    tpu.vector_store %arg6[%c336, %c0_127], %133 {strides = array<i32>} : memref<432x384xbf16, #tpu.memory_space<vmem>>, vector<16x384xbf16>,
    %c0_i32_128 = arith.constant 0 : i32
    %c0_i32_129 = arith.constant 0 : i32
    %135 = tpu.memref_slice %arg5[%118, %c0_i32_128, %c0_i32_129] : memref<4x16x512xbf16, #tpu.memory_space<vmem>> -> memref<1x16x512xbf16, #tpu.memory_space<vmem>>
    %136 = tpu.memref_squeeze %135 : memref<1x16x512xbf16, #tpu.memory_space<vmem>> -> memref<16x512xbf16, #tpu.memory_space<vmem>>
    %c0_130 = arith.constant 0 : index
    %c19_131 = arith.constant 19 : index
    %137 = vector.load %136[%c0_130, %c19_131] : memref<16x512xbf16, #tpu.memory_space<vmem>>, vector<16x384xbf16>
    %c352 = arith.constant 352 : index
    %c0_132 = arith.constant 0 : index
    %138 = vector.load %arg6[%c352, %c0_132] : memref<432x384xbf16, #tpu.memory_space<vmem>>, vector<16x384xbf16>
    tpu.vector_store %arg6[%c352, %c0_132], %137 {strides = array<i32>} : memref<432x384xbf16, #tpu.memory_space<vmem>>, vector<16x384xbf16>,
    %c0_i32_133 = arith.constant 0 : i32
    %c0_i32_134 = arith.constant 0 : i32
    %139 = tpu.memref_slice %arg5[%118, %c0_i32_133, %c0_i32_134] : memref<4x16x512xbf16, #tpu.memory_space<vmem>> -> memref<1x16x512xbf16, #tpu.memory_space<vmem>>
    %140 = tpu.memref_squeeze %139 : memref<1x16x512xbf16, #tpu.memory_space<vmem>> -> memref<16x512xbf16, #tpu.memory_space<vmem>>
    %c0_135 = arith.constant 0 : index
    %c20_136 = arith.constant 20 : index
    %141 = vector.load %140[%c0_135, %c20_136] : memref<16x512xbf16, #tpu.memory_space<vmem>>, vector<16x384xbf16>
    %c368 = arith.constant 368 : index
    %c0_137 = arith.constant 0 : index
    %142 = vector.load %arg6[%c368, %c0_137] : memref<432x384xbf16, #tpu.memory_space<vmem>>, vector<16x384xbf16>
    tpu.vector_store %arg6[%c368, %c0_137], %141 {strides = array<i32>} : memref<432x384xbf16, #tpu.memory_space<vmem>>, vector<16x384xbf16>,
    %c0_i32_138 = arith.constant 0 : i32
    %c0_i32_139 = arith.constant 0 : i32
    %143 = tpu.memref_slice %arg5[%118, %c0_i32_138, %c0_i32_139] : memref<4x16x512xbf16, #tpu.memory_space<vmem>> -> memref<1x16x512xbf16, #tpu.memory_space<vmem>>
    %144 = tpu.memref_squeeze %143 : memref<1x16x512xbf16, #tpu.memory_space<vmem>> -> memref<16x512xbf16, #tpu.memory_space<vmem>>
    %c0_140 = arith.constant 0 : index
    %c36_141 = arith.constant 36 : index
    %145 = vector.load %144[%c0_140, %c36_141] : memref<16x512xbf16, #tpu.memory_space<vmem>>, vector<16x384xbf16>
    %c384 = arith.constant 384 : index
    %c0_142 = arith.constant 0 : index
    %146 = vector.load %arg6[%c384, %c0_142] : memref<432x384xbf16, #tpu.memory_space<vmem>>, vector<16x384xbf16>
    tpu.vector_store %arg6[%c384, %c0_142], %145 {strides = array<i32>} : memref<432x384xbf16, #tpu.memory_space<vmem>>, vector<16x384xbf16>,
    %c0_i32_143 = arith.constant 0 : i32
    %c0_i32_144 = arith.constant 0 : i32
    %147 = tpu.memref_slice %arg5[%118, %c0_i32_143, %c0_i32_144] : memref<4x16x512xbf16, #tpu.memory_space<vmem>> -> memref<1x16x512xbf16, #tpu.memory_space<vmem>>
    %148 = tpu.memref_squeeze %147 : memref<1x16x512xbf16, #tpu.memory_space<vmem>> -> memref<16x512xbf16, #tpu.memory_space<vmem>>
    %c0_145 = arith.constant 0 : index
    %c37_146 = arith.constant 37 : index
    %149 = vector.load %148[%c0_145, %c37_146] : memref<16x512xbf16, #tpu.memory_space<vmem>>, vector<16x384xbf16>
    %c400 = arith.constant 400 : index
    %c0_147 = arith.constant 0 : index
    %150 = vector.load %arg6[%c400, %c0_147] : memref<432x384xbf16, #tpu.memory_space<vmem>>, vector<16x384xbf16>
    tpu.vector_store %arg6[%c400, %c0_147], %149 {strides = array<i32>} : memref<432x384xbf16, #tpu.memory_space<vmem>>, vector<16x384xbf16>,
    %c0_i32_148 = arith.constant 0 : i32
    %c0_i32_149 = arith.constant 0 : i32
    %151 = tpu.memref_slice %arg5[%118, %c0_i32_148, %c0_i32_149] : memref<4x16x512xbf16, #tpu.memory_space<vmem>> -> memref<1x16x512xbf16, #tpu.memory_space<vmem>>
    %152 = tpu.memref_squeeze %151 : memref<1x16x512xbf16, #tpu.memory_space<vmem>> -> memref<16x512xbf16, #tpu.memory_space<vmem>>
    %c0_150 = arith.constant 0 : index
    %c38_151 = arith.constant 38 : index
    %153 = vector.load %152[%c0_150, %c38_151] : memref<16x512xbf16, #tpu.memory_space<vmem>>, vector<16x384xbf16>
    %c416 = arith.constant 416 : index
    %c0_152 = arith.constant 0 : index
    %154 = vector.load %arg6[%c416, %c0_152] : memref<432x384xbf16, #tpu.memory_space<vmem>>, vector<16x384xbf16>
    tpu.vector_store %arg6[%c416, %c0_152], %153 {strides = array<i32>} : memref<432x384xbf16, #tpu.memory_space<vmem>>, vector<16x384xbf16>,
    %c0_153 = arith.constant 0 : index
    %c0_154 = arith.constant 0 : index
    %155 = vector.load %arg3[%c0_153, %c0_154] : memref<8x432xbf16, #tpu.memory_space<vmem>>, vector<8x432xbf16>
    %c0_155 = arith.constant 0 : index
    %c0_156 = arith.constant 0 : index
    %156 = vector.load %arg6[%c0_155, %c0_156] : memref<432x384xbf16, #tpu.memory_space<vmem>>, vector<432x384xbf16>
    %cst = arith.constant dense<0.000000e+00> : vector<8x384xf32>
    %157 = tpu.matmul %155, %156, %cst {dimension_numbers = #tpu.dot_dimension_numbers<[1], [0], [0], [1], [0, 0, 1, 1], [], []>} : vector<8x432xbf16>, vector<432x384xbf16>, vector<8x384xf32> -> vector<8x384xf32>
    %c0_157 = arith.constant 0 : index
    %c0_158 = arith.constant 0 : index
    %c0_159 = arith.constant 0 : index
    %c0_160 = arith.constant 0 : index
    %158 = vector.load %arg4[%c0_157, %c0_158, %c0_159, %c0_160] : memref<1x1x8x384xf32, #tpu.memory_space<vmem>>, vector<1x1x8x384xf32>
    %159 = vector.shape_cast %158 : vector<1x1x8x384xf32> to vector<8x384xf32>
    %160 = vector.shape_cast %157 : vector<8x384xf32> to vector<1x1x8x384xf32>
    tpu.vector_store %arg4[%c0_157, %c0_158, %c0_159, %c0_160], %160 {strides = array<i32>} : memref<1x1x8x384xf32, #tpu.memory_space<vmem>>, vector<1x1x8x384xf32>,
    return
  }
  func.func @transform_1(%arg0: i32, %arg1: i32) -> (i32, i32) {
    %c0_i32 = arith.constant 0 : i32
    %c0_i32_0 = arith.constant 0 : i32
    %c0_i32_1 = arith.constant 0 : i32
    return %c0_i32, %c0_i32_0 : i32, i32
  }
  func.func @transform_2(%arg0: i32, %arg1: i32) -> (i32, i32, i32, i32) {
    %c0_i32 = arith.constant 0 : i32
    %c0_i32_0 = arith.constant 0 : i32
    %c0_i32_1 = arith.constant 0 : i32
    return %arg0, %arg1, %c0_i32, %c0_i32_0 : i32, i32, i32, i32
  }
}

</mosaic_0001>

<bundles_post_ra>
// kernel: tpu_custom_call.1
= control target key start
LH: loop header
LB: loop body
LE: loop exit
PB: predicated region body
PF: predicated region fallthrough
CT: control target
= control target key end

     0   :  { %s3501_s0 = inlined_call_operand.hbm [shape: bf16[2,10,16,512], index: 0, kind: input, shape index: {}]   ;;  %s3502_s1 = inlined_call_operand.hbm [shape: bf16[8,432], index: 1, kind: input, shape index: {}]   ;;  %s3503_s2 = inlined_call_operand.hbm [shape: f32[2,8,8,384], index: 2, kind: output, shape index: {}]  }
   0x1   :  { %3517 = sst [smem:[#allocation34_spill]] %s3502_s1 }
   0x2   :  { %3518 = sst [smem:[#allocation35_spill]] %s3503_s2 }
   0x3   :  { %7 = vsyncpa [#allocation6], 0 }
   0x4   :  { %8 = vsyncpa [#allocation7], 0 }
   0x5   :  { %10 = vsyncpa [#allocation7 + $0x1], 0  ;;  %s2725_s9 = smov 0   ;;  %s2727_s10 = smov 0  }
   0x6   :  { %s2729_s11 = smov 0   ;;  %s2731_s12 = smov 0  }
   0x7   :  { %s2733_s13 = smov 0   ;;  %s2735_s14 = smov 0  }
   0x8   :  { %s2737_s15 = smov 0   ;;  %s2739_s16 = smov 0  }
   0x9 LB: > { %3519 = sst [smem:[#allocation25_spill]] %s2668_s9  ;;  %s2116_s17 = sadd.s32 4294967295, %s2696_s16   ;;  %s2696_s16 = sphi %s2739_s16, %s16_s16   ;;  %s2692_s15 = sphi %s2737_s15, %s3553_s15   ;;  %s2688_s14 = sphi %s2735_s14, %s3552_s14   ;;  %s2684_s13 = sphi %s2733_s13, %s3551_s13   ;;  %s2680_s12 = sphi %s2731_s12, %s3550_s12   ;;  %s2676_s11 = sphi %s2729_s11, %s3549_s11   ;;  %s2672_s10 = sphi %s2727_s10, %s3555_s10   ;;  %s2668_s9 = sphi %s2725_s9, %s3554_s9  }
   0xa   : > { %3520 = sst [smem:[#allocation26_spill]] %s2676_s11  ;;  %s2117_s18 = sadd.s32 4294967294, %s2696_s16  }
   0xb   : > { %3521 = sst [smem:[#allocation27_spill]] %s2688_s14  ;;  %s25_s19 = sadd.s32 1, %s2688_s14 }
   0xc   : > { %3522 = sst [smem:[#allocation28_spill]] %s2692_s15  ;;  %s28_s20 = sadd.s32 1, %s2692_s15 }
   0xd   : > { %3523 = sst [smem:[#allocation29_spill]] %s2696_s16  ;;  %p26_p0 = scmp.ge.s32.totalorder %s25_s19, 8 }
   0xe   : > { %s58_s21 = sadd.s32 1, %s2676_s11  ;;  %p68_p1 = scmp.ne.s32.totalorder %s2676_s11, %s2672_s10 }
   0xf   : > { %p69_p2 = scmp.eq.s32.totalorder %s2116_s17, 15  ;;  %s3557_s19 = smov (%p26_p0, %s25_s19), 0 }
  0x10   : > { %3524 = sst [smem:[#allocation30_spill]] %s3557_s19  ;;  %s3559_s20 = smov (!%p26_p0, %s28_s20), %s2692_s15 }
  0x11   : > { %s54_s22 = ssub.s32 %s2688_s14, %s3557_s19  ;;  %p2777_p3 = por %p69_p2, %p68_p1 }
  0x12   : > { %p30_p4 = scmp.ge.s32.totalorder %s3559_s20, 2  ;;  %p74_p5 = scmp.ne.s32.totalorder %s2672_s10, %s2668_s9 }
  0x13   : > { %p75_p6 = scmp.eq.s32.totalorder %s2117_s18, 15  ;;  %p2118_p7 = scmp.ge.s32.totalorder %s2696_s16, 1 }
  0x14   : > { %s3561_s20 = smov (%p30_p4, %s3559_s20), 0  ;;  %p82_p9 = scmp.lt.s32.totalorder %s2696_s16, 17 }
  0x15   : > { %3526 = sst [smem:[#allocation31_spill]] %s3561_s20  ;;  %p2786_p8 = por %p75_p6, %p74_p5 }
  0x16   : > { %s53_s25 = ssub.s32 %s2692_s15, %s3561_s20  ;;  %p2793_p10 = pnand %p2118_p7, %p82_p9 }
  0x17   : > { %s3527_s24 = scalar_select %p2786_p8, 1, 0 }
  0x18   : > { %s55_s26 = sor.u32 %s54_s22, %s53_s25  ;;  %p2797_p12 = scmp.eq.s32.totalorder %s2116_s17, 0 }
  0x19   : > { %3528 = sst [smem:[#allocation32_spill]] %s3527_s24  ;;  %p56_p11 = scmp.eq.s32.totalorder %s55_s26, 0 }
  0x1a   : > { %p2325_p13 = pneg %p2793_p10  ;;  %s2698_s30 = smov [#allocation5]  }
  0x1b   : > { %s2804_s29 = scalar_select %p56_p11, %s2676_s11, %s58_s21  }
  0x1c   : > { %s95_s3 = sshll.u32 %s2698_s30, 4  ;;  %p2326_p0 = pnand %p2797_p12, %p2325_p13  ;;  %s96_s3 = int_to_ptr.vmem [resolvable:$true] %s95_s3 }
  0x1d   : > { %3531 = sst [smem:[#allocation33_spill]] %s2804_s29  ;;  %s2462_s4 = scalar_lea.vmem %s96_s3, 256 }
  0x1e   : > { %p2453_p1 = pneg %p2326_p0  ;;  %p2463_p2 = scmp.ne.s32.totalorder %s96_s3, %s2462_s4 }
  0x1f   : > { %p2470_p6 = scmp.lt.s32.totalorder %s96_s3, %s96_s3  ;;  %p2471_p7 = scmp.lt.s32.totalorder %s2462_s4, %s2462_s4 }
  0x20   : > { %p2465_p4 = pnand %p2463_p2, %p2453_p1 }
  0x21   : > { %p2472_p9 = por %p2471_p7, %p2470_p6 }
  0x22   : > { %p2466_p5 = pneg %p2465_p4 }
  0x24   : > { %p2473_p8 = pnand %p2472_p9, %p2466_p5 }
  0x26   : > { %2476 = shalt.err (!%p2473_p8)
}
  0x27   : > { %s3532_s1 = sld [smem:[#allocation34_spill]] }
  0x29   : > { %108 = sbr.rel (%p2793_p10) target bundleno = 729 (0x2d9), region = 24 }
  0x2d   : > { %2328 = dma.hbm_to_vmem [thread:$0]  (!%p2326_p0), %s3532_s1, 256, %s96_s3, [#allocation6]  }
  0x2e   : > { %2643 = dma.done.wait (%p2797_p12), [#allocation6], 256  }
  0x2f   : > { %2645 = vsyncadd (%p2797_p12), [#allocation6], 4294967040  ;;  %s3504_s7 = sand.u32 1, %s2672_s10   ;;  %p3516_p8 = scmp.eq.s32.totalorder %s2680_s12, 0 }
  0x30   : > { %s2820_s8 = smul.u32 24, %s3504_s7  ;;  %p128_p10 = scmp.lt.s32.totalorder %s2680_s12, 0 }
  0x31   : > { %s129_s17 = ssub.s32 0, %s2680_s12  ;;  %s2126_s22 = sshll.u32 %s2680_s12, 3 }
  0x32   : > { %s2123_s18 = smin.u32 %s2680_s12, %s129_s17  ;;  %s141_s26 = smul.u32 80, %s2684_s13 }
  0x33   : > { %s131_s21 = sand.u32 3, %s2123_s18   ;;  %s2829_s28 = sadd.s32 1, %s2680_s12 }
  0x34   : > { %s132_s25 = ssub.s32 0, %s131_s21  ;;  %s142_s27 = sadd.s32 %s2126_s22, %s141_s26 }
  0x35   : > { %s3563_s25 = smov (!%p128_p10, %s132_s25), %s131_s21  ;;  %s2127_s3 = sshll.u32 %s142_s27, 6 }
  0x36   : > { %p2125_p11 = scmp.lt.s32.totalorder %s3563_s25, 0  ;;  %s138_s30 = sadd.s32 4, %s3563_s25 }
  0x37   : > { %p161_p12 = scmp.lt.s32.totalorder %s2829_s28, 0  ;;  %s2835_s6 = scalar_lea.hbm %s3501_s0, %s2127_s3 }
  0x38   : > { %s3565_s30 = smov (!%p2125_p11, %s138_s30), %s3563_s25  ;;  %s162_s17 = ssub.s32 0, %s2829_s28 }
  0x39   : > { %s2275_s18 = sshll.u32 %s3565_s30, 5  ;;  %s2839_s21 = smin.u32 %s162_s17, %s2829_s28 }
  0x3a   : > { %s2841_s22 = scalar_lea.vmem [#allocation2], %s2275_s18  ;;  %s3505_s27 = sand.u32 3, %s2839_s21  }
  0x3b   : > { %s156_s26 = sshll.u32 %s2841_s22, 4  ;;  %s165_s25 = ssub.s32 0, %s3505_s27  ;;  %s157_s26 = int_to_ptr.vmem [resolvable:$true] %s156_s26 }
  0x3c   : > { %s2847_s4 = scalar_lea.sflag [#allocation4], %s3565_s30  ;;  %s2850_s3 = scalar_lea.hbm %s2835_s6, 512 }
  0x3d   : > { %p2478_p13 = scmp.ne.s32.totalorder %s2835_s6, %s2850_s3  ;;  %s2859_s18 = scalar_lea.hbm %s3501_s0, 10240 }
  0x3e   : > { %p2482_p2 = scmp.lt.s32.totalorder %s2835_s6, %s3501_s0  ;;  %p2483_p4 = scmp.lt.s32.totalorder %s2859_s18, %s2850_s3 }
  0x3f   : > { %p2479_p0 = pnand %p2478_p13, %p3516_p8 }
  0x40   : > { %p2484_p5 = por %p2483_p4, %p2482_p2 }
  0x41   : > { %p2480_p1 = pneg %p2479_p0 }
  0x43   : > { %p2485_p6 = pnand %p2484_p5, %p2480_p1 }
  0x45   : > { %2488 = shalt.err (!%p2485_p6)  }
  0x46   : > { %s2489_s30 = scalar_lea.vmem %s157_s26, 512  ;;  %s2699_s27 = smov [#allocation2]  }
  0x47   : > { %p2490_p7 = scmp.ne.s32.totalorder %s157_s26, %s2489_s30  ;;  %s2493_s20 = sshll.u32 %s2699_s27, 4  ;;  %s2869_s20 = int_to_ptr.vmem [resolvable:$false] %s2493_s20 }
  0x48   : > { %s2872_s5 = scalar_lea.vmem %s2869_s20, 2048  ;;  %p2496_p11 = scmp.lt.s32.totalorder %s157_s26, %s2869_s20 }
  0x49   : > { %p2491_p9 = pnand %p2490_p7, %p3516_p8  ;;  %p2497_p13 = scmp.lt.s32.totalorder %s2872_s5, %s2489_s30 }
  0x4b   : > { %p2492_p10 = pneg %p2491_p9  ;;  %p2498_p0 = por %p2497_p13, %p2496_p11 }
  0x4d   : > { %p2499_p1 = pnand %p2498_p0, %p2492_p10 }
  0x4f   : > { %2502 = shalt.err (!%p2499_p1)  }
  0x50   : > { %2312 = dma.hbm_to_vmem [thread:$0]  (%p3516_p8), %s2835_s6, 512, %s157_s26, %s2847_s4 }
  0x51   : > { %s3533_s1 = sand.u32 3, %s2839_s21   ;;  %s2885_s27 = sadd.s32 2, %s2680_s12 }
  0x52   : > { %s3567_s25 = smov (!%p161_p12, %s165_s25), %s3533_s1  ;;  %s194_s17 = ssub.s32 0, %s2885_s27 }
  0x53   : > { %p2132_p2 = scmp.lt.s32.totalorder %s3567_s25, 0  ;;  %s171_s7 = sadd.s32 4, %s3567_s25 }
  0x54   : > { %s2137_s26 = smin.u32 %s194_s17, %s2885_s27  ;;  %s2896_s29 = scalar_lea.hbm %s2835_s6, 1024 }
  0x55   : > { %s3569_s7 = smov (!%p2132_p2, %s171_s7), %s3567_s25  ;;  %s196_s19 = sand.u32 3, %s2137_s26  }
  0x56   : > { %s2276_s30 = sshll.u32 %s3569_s7, 5  ;;  %s197_s15 = ssub.s32 0, %s196_s19 }
  0x57   : > { %s2890_s21 = scalar_lea.vmem [#allocation2], %s2276_s30  ;;  %s2893_s14 = scalar_lea.sflag [#allocation4], %s3569_s7 }
  0x58   : > { %s188_s1 = sshll.u32 %s2890_s21, 4  ;;  %p2504_p12 = scmp.ne.s32.totalorder %s2850_s3, %s2896_s29  ;;  %s189_s1 = int_to_ptr.vmem [resolvable:$true] %s188_s1 }
  0x59   : > { %p2508_p7 = scmp.lt.s32.totalorder %s2850_s3, %s3501_s0  ;;  %p2509_p9 = scmp.lt.s32.totalorder %s2859_s18, %s2896_s29 }
  0x5a   : > { %p2505_p5 = pnand %p2504_p12, %p3516_p8 }
  0x5b   : > { %p2510_p10 = por %p2509_p9, %p2508_p7 }
  0x5c   : > { %p2506_p6 = pneg %p2505_p5 }
  0x5e   : > { %p2511_p11 = pnand %p2510_p10, %p2506_p6 }
  0x60   : > { %2514 = shalt.err (!%p2511_p11)  }
  0x61   : > { %s2515_s17 = scalar_lea.vmem %s189_s1, 512  ;;  %p2522_p2 = scmp.lt.s32.totalorder %s189_s1, %s2869_s20 }
  0x62   : > { %p2516_p13 = scmp.ne.s32.totalorder %s189_s1, %s2515_s17  ;;  %p2523_p4 = scmp.lt.s32.totalorder %s2872_s5, %s2515_s17 }
  0x64   : > { %p2517_p0 = pnand %p2516_p13, %p3516_p8  ;;  %p2524_p12 = por %p2523_p4, %p2522_p2 }
  0x66   : > { %p2518_p1 = pneg %p2517_p0 }
  0x68   : > { %p2525_p5 = pnand %p2524_p12, %p2518_p1 }
  0x6a   : > { %2528 = shalt.err (!%p2525_p5)  }
  0x6b   : > { %2313 = dma.hbm_to_vmem [thread:$0]  (%p3516_p8), %s2850_s3, 512, %s189_s1, %s2893_s14 }
  0x6c   : > { %p3534_p6 = scmp.lt.s32.totalorder %s2885_s27, 0  ;;  %s2919_s11 = sadd.s32 3, %s2680_s12 }
  0x6d   : > { %s231_s30 = ssub.s32 0, %s2919_s11  ;;  %s2930_s24 = scalar_lea.hbm %s2835_s6, 1536 }
  0x6e   : > { %s3571_s15 = smov (!%p3534_p6, %s197_s15), %s196_s19  ;;  %s2145_s26 = smin.u32 %s231_s30, %s2919_s11 }
  0x6f   : > { %p2139_p4 = scmp.lt.s32.totalorder %s3571_s15, 0  ;;  %s203_s7 = sadd.s32 4, %s3571_s15 }
  0x70   : > { %s233_s3 = sand.u32 3, %s2145_s26   ;;  %p2531_p9 = scmp.ne.s32.totalorder %s2896_s29, %s2930_s24 }
  0x71   : > { %s3573_s7 = smov (!%p2139_p4, %s203_s7), %s3571_s15  ;;  %s234_s1 = ssub.s32 0, %s233_s3 }
  0x72   : > { %s2277_s25 = sshll.u32 %s3573_s7, 5  ;;  %s2927_s17 = scalar_lea.sflag [#allocation4], %s3573_s7 }
  0x73   : > { %s2924_s27 = scalar_lea.vmem [#allocation2], %s2277_s25  ;;  %p2532_p10 = pnand %p2531_p9, %p3516_p8 }
  0x74   : > { %s220_s19 = sshll.u32 %s2924_s27, 4  ;;  %p2535_p13 = scmp.lt.s32.totalorder %s2896_s29, %s3501_s0  ;;  %s221_s19 = int_to_ptr.vmem [resolvable:$true] %s220_s19 }
  0x75   : > { %p2533_p11 = pneg %p2532_p10  ;;  %p2536_p0 = scmp.lt.s32.totalorder %s2859_s18, %s2930_s24 }
  0x77   : > { %p2537_p1 = por %p2536_p0, %p2535_p13 }
  0x79   : > { %p2538_p2 = pnand %p2537_p1, %p2533_p11 }
  0x7b   : > { %2541 = shalt.err (!%p2538_p2)  }
  0x7c   : > { %s2542_s26 = scalar_lea.vmem %s221_s19, 512  ;;  %p2549_p4 = scmp.lt.s32.totalorder %s221_s19, %s2869_s20 }
  0x7d   : > { %p2543_p12 = scmp.ne.s32.totalorder %s221_s19, %s2542_s26  ;;  %p2550_p7 = scmp.lt.s32.totalorder %s2872_s5, %s2542_s26 }
  0x7f   : > { %p2544_p5 = pnand %p2543_p12, %p3516_p8  ;;  %p2551_p9 = por %p2550_p7, %p2549_p4 }
  0x81   : > { %p2545_p6 = pneg %p2544_p5 }
  0x83   : > { %p2552_p10 = pnand %p2551_p9, %p2545_p6 }
  0x85   : > { %2555 = shalt.err (!%p2552_p10)  }
  0x86   : > { %2314 = dma.hbm_to_vmem [thread:$0]  (%p3516_p8), %s2896_s29, 512, %s221_s19, %s2927_s17 }
  0x87   : > { %p3535_p11 = scmp.lt.s32.totalorder %s2919_s11, 0  ;;  %p2336_p7 = scmp.lt.s32.totalorder %s2829_s28, 8 }
  0x88   : > { %s2583_s9 = scalar_lea.hbm %s2835_s6, 2048  ;;  %p2562_p12 = scmp.lt.s32.totalorder %s2930_s24, %s3501_s0 }
  0x89   : > { %s3575_s1 = smov (!%p3535_p11, %s234_s1), %s233_s3  ;;  %p2558_p0 = scmp.ne.s32.totalorder %s2930_s24, %s2583_s9 }
  0x8a   : > { %p2147_p13 = scmp.lt.s32.totalorder %s3575_s1, 0  ;;  %s240_s7 = sadd.s32 4, %s3575_s1 }
  0x8b   : > { %p2559_p1 = pnand %p2558_p0, %p2336_p7  ;;  %p2563_p5 = scmp.lt.s32.totalorder %s2859_s18, %s2583_s9 }
  0x8c   : > { %s3577_s7 = smov (!%p2147_p13, %s240_s7), %s3575_s1 }
  0x8d   : > { %s2278_s25 = sshll.u32 %s3577_s7, 5  ;;  %s250_s26 = scalar_lea.sflag [#allocation4], %s3577_s7 }
  0x8e   : > { %s249_s15 = scalar_lea.vmem [#allocation2], %s2278_s25  ;;  %p2560_p2 = pneg %p2559_p1 }
  0x8f   : > { %s258_s30 = sshll.u32 %s249_s15, 4  ;;  %p2564_p6 = por %p2563_p5, %p2562_p12  ;;  %s259_s30 = int_to_ptr.vmem [resolvable:$true] %s258_s30 }
  0x91   : > { %p2565_p4 = pnand %p2564_p6, %p2560_p2 }
  0x93   : > { %2568 = shalt.err (!%p2565_p4)  }
  0x94   : > { %s2569_s29 = scalar_lea.vmem %s259_s30, 512  ;;  %p2576_p13 = scmp.lt.s32.totalorder %s259_s30, %s2869_s20 }
  0x95   : > { %p2570_p9 = scmp.ne.s32.totalorder %s259_s30, %s2569_s29  ;;  %p2577_p8 = scmp.lt.s32.totalorder %s2872_s5, %s2569_s29 }
  0x97   : > { %p2571_p10 = pnand %p2570_p9, %p2336_p7  ;;  %p2578_p0 = por %p2577_p8, %p2576_p13 }
  0x99   : > { %p2572_p11 = pneg %p2571_p10 }
  0x9b   : > { %p2579_p1 = pnand %p2578_p0, %p2572_p11 }
  0x9d   : > { %2582 = shalt.err (!%p2579_p1)  }
  0x9e   : > { %2316 = dma.hbm_to_vmem [thread:$0]  (%p2336_p7), %s2930_s24, 512, %s259_s30, %s250_s26 }
  0x9f   : > { %s2970_s2 = scalar_lea.vmem [#allocation8], %s2820_s8  ;;  %p3536_p2 = scmp.eq.s32.totalorder %s2680_s12, 0 }
  0xa1   : > { %2647 = dma.done.wait (%p3536_p2), %s2847_s4, 512  ;;  %p3537_p12 = pmov %p3536_p2 }
  0xa2   : > { %p3538_p5 = pmov %p3536_p2 }
  0xa3   : > { %2649 = vsyncadd (%p3537_p12), %s2847_s4, 4294966784 }
  0xa4   : > { %2651 = dma.done.wait (%p3538_p5), %s2893_s14, 512  ;;  %p3539_p8 = pmov %p3536_p2 }
  0xa5   : > { %p3540_p6 = pmov %p3536_p2 }
  0xa6   : > { %2653 = vsyncadd (%p3539_p8), %s2893_s14, 4294966784 }
  0xa7   : > { %2655 = dma.done.wait (%p3540_p6), %s2927_s17, 512  ;;  %p3541_p7 = pmov %p3536_p2 }
  0xa8   : > { %p2338_p4 = scmp.gt.s32.totalorder %s2680_s12, 0 }
  0xa9   : > { %2657 = vsyncadd (%p3541_p7), %s2927_s17, 4294966784 }
  0xaa   : > { %2659 = dma.done.wait (%p2338_p4), %s2927_s17, 512 }
  0xab   : > { %2661 = vsyncadd (%p2338_p4), %s2927_s17, 4294966784  ;;  %v2994_v0 = vld [vmem:[%s2841_s22 + $0x10] sm:$0xff]  ;;  %v2997_v1 = vld [vmem:[%s2841_s22] sm:$0xff]  ;;  %s2700_s9 = smov 91   ;;  %s2701_s14 = smov 92   ;;  %vm378_vm0 = vcmask 1043456  }
  0xac   : > { %581 = vrot.lane.b32.xlu1 %v2994_v0, %s2700_s9  ;;  %577 = vrot.lane.b32.xlu0 %v2997_v1, %s2700_s9  ;;  %v3004_v2 = vld [vmem:[%s2841_s22 + $0x18] sm:$0xff]  ;;  %v3007_v3 = vld [vmem:[%s2841_s22 + $0x8] sm:$0xff]  ;;  %s2702_s16 = smov 108   ;;  %s2703_s20 = smov 109   ;;  %vm590_vm1 = vcmask 744448   ;;  %vm555_vm2 = vcmask 752640  }
  0xad   : > { %s2704_s24 = smov 110   ;;  %s2705_s8 = smov 126   ;;  %v3062_v4 = vld [vmem:[%s2924_s27 + $0x8] sm:$0xff]  ;;  %v3065_v5 = vld [vmem:[%s2924_s27] sm:$0xff]  ;;  %v3072_v6 = vld [vmem:[%s2924_s27 + $0x18] sm:$0xff]  ;;  %vm520_vm3 = vcmask 883712  }
  0xae   : > { %s2706_s28 = smov 127   ;;  %v3075_v7 = vld [vmem:[%s2924_s27 + $0x10] sm:$0xff]  ;;  %v3082_v8 = vld [vmem:[%s2890_s21 + $0x8] sm:$0xff]  ;;  %v3085_v9 = vld [vmem:[%s2890_s21] sm:$0xff]  ;;  %vm485_vm4 = vcmask 891904   ;;  %s2707_s6 = smov 90  }
  0xaf   : > { %v3092_v10 = vld [vmem:[%s2890_s21 + $0x18] sm:$0xff]  ;;  %v3095_v11 = vld [vmem:[%s2890_s21 + $0x10] sm:$0xff]  ;;  %v3181_v53 = vld [vmem:[%s2924_s27] sm:$0xff]  ;;  %vm450_vm5 = vcmask 900096   ;;  %vm415_vm6 = vcmask 1031168   ;;  %vm380_vm7 = vcmask 1039360  }
  0xb0   : > { %583 = vrot.lane.b32.xlu1 %v3004_v2, %s2700_s9  ;;  %579 = vrot.lane.b32.xlu0 %v3007_v3, %s2700_s9  ;;  %v3184_v54 = vld [vmem:[%s2924_s27 + $0x10] sm:$0xff]  ;;  %vm1785_vm8 = vcmask 392192   ;;  %vm625_vm9 = vcmask 736256   ;;  %s2306_s4 = smul.u32 24, %s2684_s13  ;;  %s3543_s1 = sand.u32 1, %s2672_s10  }
  0xb1   : > { %v2240_v57 = vcombine.high %v3181_v53, %v3184_v54  ;;  %v2239_v58 = vcombine.low %v3181_v53, %v3184_v54  ;;  %s2709_s17 = smov [#allocation8]  }
  0xb2   : > { %s2588_s7 = sshll.u32 %s2709_s17, 4  ;;  %s2589_s7 = int_to_ptr.vmem [resolvable:$false] %s2588_s7 }
  0xb3   : > { %s2590_s25 = scalar_lea.vmem %s2589_s7, 768 }
  0xb4   : > { %544 = vrot.lane.b32.xlu1 %v3007_v3, %s2701_s14  ;;  %542 = vrot.lane.b32.xlu0 %v2997_v1, %s2701_s14 }
  0xb8   : > { %548 = vrot.lane.b32.xlu1 %v3004_v2, %s2701_s14  ;;  %546 = vrot.lane.b32.xlu0 %v2994_v0, %s2701_s14 }
  0xbc   : > { %509 = vrot.lane.b32.xlu1 %v3007_v3, %s2702_s16  ;;  %507 = vrot.lane.b32.xlu0 %v2997_v1, %s2702_s16 }
  0xc0   : > { %513 = vrot.lane.b32.xlu1 %v3004_v2, %s2702_s16  ;;  %511 = vrot.lane.b32.xlu0 %v2994_v0, %s2702_s16 }
  0xc4   : > { %474 = vrot.lane.b32.xlu1 %v3007_v3, %s2703_s20  ;;  %472 = vrot.lane.b32.xlu0 %v2997_v1, %s2703_s20 }
  0xc8   : > { %478 = vrot.lane.b32.xlu1 %v3004_v2, %s2703_s20  ;;  %476 = vrot.lane.b32.xlu0 %v2994_v0, %s2703_s20 }
  0xcc   : > { %439 = vrot.lane.b32.xlu1 %v3007_v3, %s2704_s24  ;;  %437 = vrot.lane.b32.xlu0 %v2997_v1, %s2704_s24 }
  0xd0   : > { %443 = vrot.lane.b32.xlu1 %v3004_v2, %s2704_s24  ;;  %441 = vrot.lane.b32.xlu0 %v2994_v0, %s2704_s24 }
  0xd4   : > { %404 = vrot.lane.b32.xlu1 %v3007_v3, %s2705_s8  ;;  %402 = vrot.lane.b32.xlu0 %v2997_v1, %s2705_s8 }
  0xd8   : > { %408 = vrot.lane.b32.xlu1 %v3004_v2, %s2705_s8  ;;  %406 = vrot.lane.b32.xlu0 %v2994_v0, %s2705_s8 }
  0xdc   : > { %368 = vrot.lane.b32.xlu1 %v3007_v3, %s2706_s28  ;;  %366 = vrot.lane.b32.xlu0 %v2997_v1, %s2706_s28 }
  0xe0   : > { %372 = vrot.lane.b32.xlu1 %v3004_v2, %s2706_s28  ;;  %370 = vrot.lane.b32.xlu0 %v2994_v0, %s2706_s28 }
  0xe4   : > { %1104 = vrot.lane.b32.xlu1 %v3062_v4, %s2702_s16  ;;  %1102 = vrot.lane.b32.xlu0 %v3065_v5, %s2702_s16 }
  0xe8   : > { %1108 = vrot.lane.b32.xlu1 %v3072_v6, %s2702_s16  ;;  %1106 = vrot.lane.b32.xlu0 %v3075_v7, %s2702_s16 }
  0xec   : > { %842 = vrot.lane.b32.xlu1 %v3082_v8, %s2701_s14  ;;  %840 = vrot.lane.b32.xlu0 %v3085_v9, %s2701_s14 }
  0xf0   : > { %846 = vrot.lane.b32.xlu1 %v3092_v10, %s2701_s14  ;;  %844 = vrot.lane.b32.xlu0 %v3095_v11, %s2701_s14 }
  0xf4   : > { %1070 = vrot.lane.b32.xlu1 %v3062_v4, %s2703_s20  ;;  %1068 = vrot.lane.b32.xlu0 %v3065_v5, %s2703_s20 }
  0xf8   : > { %1074 = vrot.lane.b32.xlu1 %v3072_v6, %s2703_s20  ;;  %1072 = vrot.lane.b32.xlu0 %v3075_v7, %s2703_s20 }
  0xfc   : > { %808 = vrot.lane.b32.xlu1 %v3082_v8, %s2702_s16  ;;  %806 = vrot.lane.b32.xlu0 %v3085_v9, %s2702_s16 }
 0x100   : > { %812 = vrot.lane.b32.xlu1 %v3092_v10, %s2702_s16  ;;  %810 = vrot.lane.b32.xlu0 %v3095_v11, %s2702_s16 }
 0x104   : > { %1036 = vrot.lane.b32.xlu1 %v3062_v4, %s2704_s24  ;;  %1034 = vrot.lane.b32.xlu0 %v3065_v5, %s2704_s24 }
 0x108   : > { %1040 = vrot.lane.b32.xlu1 %v3072_v6, %s2704_s24  ;;  %1038 = vrot.lane.b32.xlu0 %v3075_v7, %s2704_s24 }
 0x10c   : > { %774 = vrot.lane.b32.xlu1 %v3082_v8, %s2703_s20  ;;  %772 = vrot.lane.b32.xlu0 %v3085_v9, %s2703_s20 }
 0x110   : > { %778 = vrot.lane.b32.xlu1 %v3092_v10, %s2703_s20  ;;  %776 = vrot.lane.b32.xlu0 %v3095_v11, %s2703_s20 }
 0x114   : > { %1002 = vrot.lane.b32.xlu1 %v3062_v4, %s2705_s8  ;;  %1000 = vrot.lane.b32.xlu0 %v3065_v5, %s2705_s8 }
 0x118   : > { %1006 = vrot.lane.b32.xlu1 %v3072_v6, %s2705_s8  ;;  %1004 = vrot.lane.b32.xlu0 %v3075_v7, %s2705_s8 }
 0x11c   : > { %740 = vrot.lane.b32.xlu1 %v3082_v8, %s2704_s24  ;;  %738 = vrot.lane.b32.xlu0 %v3085_v9, %s2704_s24 }
 0x11e   : > { %v582_v12 = vpop.permute.xlu1 %581  ;;  %v578_v13 = vpop.permute.xlu0 %577 }
 0x11f   : > { %v587_v16 = vrot.slane %v582_v12, 4  ;;  %v585_v17 = vrot.slane %v578_v13, 4 }
 0x120   : > { %744 = vrot.lane.b32.xlu1 %v3092_v10, %s2704_s24  ;;  %742 = vrot.lane.b32.xlu0 %v3095_v11, %s2704_s24 }
 0x122   : > { %v584_v14 = vpop.permute.xlu1 %583  ;;  %v580_v15 = vpop.permute.xlu0 %579 }
 0x123   : > { %v588_v18 = vrot.slane %v584_v14, 4  ;;  %v586_v19 = vrot.slane %v580_v15, 4 }
 0x124   : > { %968 = vrot.lane.b32.xlu1 %v3062_v4, %s2706_s28  ;;  %966 = vrot.lane.b32.xlu0 %v3065_v5, %s2706_s28 }
 0x125   : > { %v593_v20 = vsel %vm378_vm0, %v587_v16, %v588_v18  ;;  %v595_v21 = vsel %vm590_vm1, %v584_v14, %v588_v18  ;;  %v589_v22 = vsel %vm378_vm0, %v585_v17, %v586_v19  ;;  %v592_v23 = vsel %vm590_vm1, %v580_v15, %v586_v19 }
 0x126   : > { %v594_v24 = vsel %vm590_vm1, %v582_v12, %v593_v20  ;;  %603 = vst [vmem:[#allocation3 + $0xbc] sm:$0xf] %v595_v21  ;;  %v591_v25 = vsel %vm590_vm1, %v578_v13, %v589_v22  ;;  %601 = vst [vmem:[#allocation3 + $0xb0] sm:$0xf] %v592_v23  ;;  %v545_v26 = vpop.permute.xlu1 %544  ;;  %v543_v27 = vpop.permute.xlu0 %542 }
 0x127   : > { %v551_v28 = vrot.slane %v545_v26, 4  ;;  %v550_v29 = vrot.slane %v543_v27, 4  ;;  %v2207_v30 = vcombine.high %v591_v25, %v594_v24  ;;  %v2206_v31 = vcombine.low %v591_v25, %v594_v24 }
 0x128   : > { %972 = vrot.lane.b32.xlu1 %v3072_v6, %s2706_s28  ;;  %970 = vrot.lane.b32.xlu0 %v3075_v7, %s2706_s28 }
 0x129   : > { %v557_v32 = vsel %vm555_vm2, %v545_v26, %v551_v28  ;;  %v554_v33 = vsel %vm378_vm0, %v550_v29, %v551_v28  ;;  %1789 = vmatprep.subr.bf16.mxu0 %v2207_v30 }
 0x12a   : > { %566 = vst [vmem:[#allocation3 + $0x98] sm:$0xf] %v557_v32  ;;  %v556_v34 = vsel %vm555_vm2, %v543_v27, %v554_v33  ;;  %v549_v35 = vpop.permute.xlu1 %548  ;;  %v547_v36 = vpop.permute.xlu0 %546  ;;  %1790 = vmatpush1.bf16.msra.mxu0 %v2206_v31 }
 0x12b   : > { %v553_v37 = vrot.slane %v549_v35, 4  ;;  %v552_v38 = vrot.slane %v547_v36, 4 }
 0x12c   : > { %706 = vrot.lane.b32.xlu1 %v3082_v8, %s2705_s8  ;;  %704 = vrot.lane.b32.xlu0 %v3085_v9, %s2705_s8 }
 0x12d   : > { %v560_v39 = vsel %vm555_vm2, %v549_v35, %v553_v37  ;;  %v558_v40 = vsel %vm378_vm0, %v552_v38, %v553_v37  ;;  %v3219_v37 = vld [vmem:[%s2890_s21] sm:$0xff]  ;;  %v3222_v38 = vld [vmem:[%s2890_s21 + $0x10] sm:$0xff] }
 0x12e   : > { %568 = vst [vmem:[#allocation3 + $0xa4] sm:$0xf] %v560_v39  ;;  %v559_v41 = vsel %vm555_vm2, %v547_v36, %v558_v40  ;;  %v510_v42 = vpop.permute.xlu1 %509  ;;  %v508_v43 = vpop.permute.xlu0 %507 }
 0x12f   : > { %v516_v44 = vrot.slane %v510_v42, 4  ;;  %v515_v45 = vrot.slane %v508_v43, 4  ;;  %v2204_v46 = vcombine.high %v556_v34, %v559_v41  ;;  %v2203_v47 = vcombine.low %v556_v34, %v559_v41 }
 0x130   : > { %710 = vrot.lane.b32.xlu1 %v3092_v10, %s2705_s8  ;;  %708 = vrot.lane.b32.xlu0 %v3095_v11, %s2705_s8  ;;  %v2213_v41 = vcombine.high %v3219_v37, %v3222_v38 }
 0x131   : > { %v522_v48 = vsel %vm520_vm3, %v510_v42, %v516_v44  ;;  %v519_v49 = vsel %vm378_vm0, %v515_v45, %v516_v44  ;;  %1791 = vmatprep.subr.bf16.mxu0 %v2204_v46  ;;  %v2212_v42 = vcombine.low %v3219_v37, %v3222_v38 }
 0x132   : > { %531 = vst [vmem:[#allocation3 + $0x80] sm:$0xf] %v522_v48  ;;  %v521_v50 = vsel %vm520_vm3, %v508_v43, %v519_v49  ;;  %v514_v51 = vpop.permute.xlu1 %513  ;;  %v512_v52 = vpop.permute.xlu0 %511  ;;  %1792 = vmatpush1.bf16.msra.mxu0 %v2203_v47 }
 0x133   : > { %v518_v55 = vrot.slane %v514_v51, 4  ;;  %v517_v56 = vrot.slane %v512_v52, 4 }
 0x134   : > { %672 = vrot.lane.b32.xlu1 %v3082_v8, %s2706_s28  ;;  %670 = vrot.lane.b32.xlu0 %v3085_v9, %s2706_s28 }
 0x135   : > { %v525_v59 = vsel %vm520_vm3, %v514_v51, %v518_v55  ;;  %v523_v60 = vsel %vm378_vm0, %v517_v56, %v518_v55 }
 0x136   : > { %533 = vst [vmem:[#allocation3 + $0x8c] sm:$0xf] %v525_v59  ;;  %v524_v61 = vsel %vm520_vm3, %v512_v52, %v523_v60  ;;  %v475_v62 = vpop.permute.xlu1 %474  ;;  %v473_v63 = vpop.permute.xlu0 %472  ;;  %v3242_v59 = vld [vmem:[#allocation5] sm:$0xff] }
 0x137   : > { %v481_v12 = vrot.slane %v475_v62, 4  ;;  %v480_v13 = vrot.slane %v473_v63, 4  ;;  %v2201_v14 = vcombine.high %v521_v50, %v524_v61  ;;  %v2200_v15 = vcombine.low %v521_v50, %v524_v61 }
 0x138   : > { %676 = vrot.lane.b32.xlu1 %v3092_v10, %s2706_s28  ;;  %674 = vrot.lane.b32.xlu0 %v3095_v11, %s2706_s28 }
 0x139   : > { %v487_v16 = vsel %vm485_vm4, %v475_v62, %v481_v12  ;;  %v484_v17 = vsel %vm378_vm0, %v480_v13, %v481_v12  ;;  %1793 = vmatprep.subr.bf16.mxu0 %v2201_v14 }
 0x13a   : > { %496 = vst [vmem:[#allocation3 + $0x68] sm:$0xf] %v487_v16  ;;  %v486_v18 = vsel %vm485_vm4, %v473_v63, %v484_v17  ;;  %v479_v19 = vpop.permute.xlu1 %478  ;;  %v477_v20 = vpop.permute.xlu0 %476  ;;  %1794 = vmatpush1.bf16.msra.mxu0 %v2200_v15 }
 0x13b   : > { %v483_v21 = vrot.slane %v479_v19, 4  ;;  %v482_v22 = vrot.slane %v477_v20, 4 }
 0x13c   : > { %910 = vrot.lane.b32.xlu1 %v3082_v8, %s2707_s6  ;;  %908 = vrot.lane.b32.xlu0 %v3085_v9, %s2707_s6 }
 0x13d   : > { %v490_v23 = vsel %vm485_vm4, %v479_v19, %v483_v21  ;;  %v488_v24 = vsel %vm378_vm0, %v482_v22, %v483_v21 }
 0x13e   : > { %498 = vst [vmem:[#allocation3 + $0x74] sm:$0xf] %v490_v23  ;;  %v489_v25 = vsel %vm485_vm4, %v477_v20, %v488_v24  ;;  %v440_v26 = vpop.permute.xlu1 %439  ;;  %v438_v27 = vpop.permute.xlu0 %437 }
 0x13f   : > { %v446_v28 = vrot.slane %v440_v26, 4  ;;  %v445_v29 = vrot.slane %v438_v27, 4  ;;  %v2198_v30 = vcombine.high %v486_v18, %v489_v25  ;;  %v2197_v31 = vcombine.low %v486_v18, %v489_v25 }
 0x140   : > { %914 = vrot.lane.b32.xlu1 %v3092_v10, %s2707_s6  ;;  %912 = vrot.lane.b32.xlu0 %v3095_v11, %s2707_s6 }
 0x141   : > { %v452_v32 = vsel %vm450_vm5, %v440_v26, %v446_v28  ;;  %v449_v33 = vsel %vm378_vm0, %v445_v29, %v446_v28  ;;  %1795 = vmatprep.subr.bf16.mxu0 %v2198_v30  ;;  %v2186_v28 = vcombine.high %v2997_v1, %v2994_v0 }
 0x142   : > { %461 = vst [vmem:[#allocation3 + $0x50] sm:$0xf] %v452_v32  ;;  %v451_v34 = vsel %vm450_vm5, %v438_v27, %v449_v33  ;;  %v444_v35 = vpop.permute.xlu1 %443  ;;  %v442_v36 = vpop.permute.xlu0 %441  ;;  %1796 = vmatpush1.bf16.msra.mxu0 %v2197_v31  ;;  %v951_v33 = vld [vmem:[%s2924_s27 + $0x8] sm:$0xf] }
 0x143   : > { %v448_v39 = vrot.slane %v444_v35, 4  ;;  %v447_v40 = vrot.slane %v442_v36, 4  ;;  %955 = vst [vmem:[#allocation3 + $0x1b8] sm:$0xf] %v951_v33 }
 0x144   : > { %876 = vrot.lane.b32.xlu1 %v3082_v8, %s2700_s9  ;;  %874 = vrot.lane.b32.xlu0 %v3085_v9, %s2700_s9 }
 0x145   : > { %v455_v43 = vsel %vm450_vm5, %v444_v35, %v448_v39  ;;  %v453_v44 = vsel %vm378_vm0, %v447_v40, %v448_v39 }
 0x146   : > { %463 = vst [vmem:[#allocation3 + $0x5c] sm:$0xf] %v455_v43  ;;  %v454_v45 = vsel %vm450_vm5, %v442_v36, %v453_v44  ;;  %v405_v46 = vpop.permute.xlu1 %404  ;;  %v403_v47 = vpop.permute.xlu0 %402  ;;  %v2185_v44 = vcombine.low %v2997_v1, %v2994_v0 }
 0x147   : > { %v411_v48 = vrot.slane %v405_v46, 4  ;;  %v410_v49 = vrot.slane %v403_v47, 4  ;;  %v2195_v50 = vcombine.high %v451_v34, %v454_v45  ;;  %v2194_v8 = vcombine.low %v451_v34, %v454_v45  ;;  %v953_v34 = vld [vmem:[%s2924_s27 + $0x18] sm:$0xf]  ;;  %s3542_s27 = sld [smem:[#allocation35_spill]] }
 0x148   : > { %880 = vrot.lane.b32.xlu1 %v3092_v10, %s2700_s9  ;;  %878 = vrot.lane.b32.xlu0 %v3095_v11, %s2700_s9  ;;  %v3246_v10 = vcombine.high %v3242_v59, %v3242_v59  ;;  %957 = vst [vmem:[#allocation3 + $0x1c4] sm:$0xf] %v953_v34 }
 0x149   : > { %v417_v9 = vsel %vm415_vm6, %v405_v46, %v411_v48  ;;  %v414_v51 = vsel %vm378_vm0, %v410_v49, %v411_v48  ;;  %1797 = vmatprep.subr.bf16.mxu0 %v2195_v50 }
 0x14a   : > { %426 = vst [vmem:[#allocation3 + $0x38] sm:$0xf] %v417_v9  ;;  %v416_v52 = vsel %vm415_vm6, %v403_v47, %v414_v51  ;;  %v409_v55 = vpop.permute.xlu1 %408  ;;  %v407_v56 = vpop.permute.xlu0 %406  ;;  %1798 = vmatpush1.bf16.msra.mxu0 %v2194_v8  ;;  %1821 = vmatprep.mubr.bf16.mxu0 %v3246_v10 }
 0x14b   : > { %v413_v60 = vrot.slane %v409_v55, 4  ;;  %v412_v61 = vrot.slane %v407_v56, 4 }
 0x14c   : > { %614 = vrot.lane.b32.xlu1 %v3007_v3, %s2707_s6  ;;  %612 = vrot.lane.b32.xlu0 %v2997_v1, %s2707_s6 }
 0x14d   : > { %v420_v11 = vsel %vm415_vm6, %v409_v55, %v413_v60  ;;  %v418_v62 = vsel %vm378_vm0, %v412_v61, %v413_v60 }
 0x14e   : > { %428 = vst [vmem:[#allocation3 + $0x44] sm:$0xf] %v420_v11  ;;  %v419_v63 = vsel %vm415_vm6, %v407_v56, %v418_v62  ;;  %v369_v12 = vpop.permute.xlu1 %368  ;;  %v367_v13 = vpop.permute.xlu0 %366  ;;  %v3296_v56 = vld [vmem:[#allocation5 + $0x8] sm:$0xff] }
 0x14f   : > { %v375_v14 = vrot.slane %v369_v12, 4  ;;  %v374_v15 = vrot.slane %v367_v13, 4  ;;  %v2192_v16 = vcombine.high %v416_v52, %v419_v63  ;;  %v2191_v17 = vcombine.low %v416_v52, %v419_v63 }
 0x150   : > { %618 = vrot.lane.b32.xlu1 %v3004_v2, %s2707_s6  ;;  %616 = vrot.lane.b32.xlu0 %v2994_v0, %s2707_s6  ;;  %v3301_v62 = vcombine.high %v3296_v56, %v3296_v56 }
 0x151   : > { %v382_v3 = vsel %vm380_vm7, %v369_v12, %v375_v14  ;;  %v379_v18 = vsel %vm378_vm0, %v374_v15, %v375_v14  ;;  %1799 = vmatprep.subr.bf16.mxu0 %v2192_v16 }
 0x152   : > { %391 = vst [vmem:[#allocation3 + $0x20] sm:$0xf] %v382_v3  ;;  %v381_v19 = vsel %vm380_vm7, %v367_v13, %v379_v18  ;;  %v373_v20 = vpop.permute.xlu1 %372  ;;  %v371_v21 = vpop.permute.xlu0 %370  ;;  %1800 = vmatpush1.bf16.msra.mxu0 %v2191_v17  ;;  %2266 = vmatprep.mubr.msk.bf16.mxu1 %vm1785_vm8, %v3301_v62 }
 0x153   : > { %v377_v22 = vrot.slane %v373_v20, 4  ;;  %v376_v23 = vrot.slane %v371_v21, 4 }
 0x154   : > { %1206 = vrot.lane.b32.xlu1 %v3062_v4, %s2707_s6  ;;  %1204 = vrot.lane.b32.xlu0 %v3065_v5, %s2707_s6 }
 0x155   : > { %v385_v2 = vsel %vm380_vm7, %v373_v20, %v377_v22  ;;  %v383_v24 = vsel %vm378_vm0, %v376_v23, %v377_v22 }
 0x156   : > { %393 = vst [vmem:[#allocation3 + $0x2c] sm:$0xf] %v385_v2  ;;  %v384_v25 = vsel %vm380_vm7, %v371_v21, %v383_v24  ;;  %v1105_v26 = vpop.permute.xlu1 %1104  ;;  %v1103_v27 = vpop.permute.xlu0 %1102 }
 0x157   : > { %v1111_v29 = vrot.slane %v1105_v26, 4  ;;  %v1110_v30 = vrot.slane %v1103_v27, 4  ;;  %v2189_v31 = vcombine.high %v381_v19, %v384_v25  ;;  %v2188_v32 = vcombine.low %v381_v19, %v384_v25 }
 0x158   : > { %1210 = vrot.lane.b32.xlu1 %v3072_v6, %s2707_s6  ;;  %1208 = vrot.lane.b32.xlu0 %v3075_v7, %s2707_s6 }
 0x159   : > { %v1116_v35 = vsel %vm520_vm3, %v1105_v26, %v1111_v29  ;;  %v1114_v36 = vsel %vm378_vm0, %v1110_v30, %v1111_v29  ;;  %1801 = vmatprep.subr.bf16.mxu0 %v2189_v31 }
 0x15a   : > { %1125 = vst [vmem:[#allocation3 + $0x230] sm:$0xf] %v1116_v35  ;;  %v1115_v39 = vsel %vm520_vm3, %v1103_v27, %v1114_v36  ;;  %v1109_v40 = vpop.permute.xlu1 %1108  ;;  %v1107_v43 = vpop.permute.xlu0 %1106  ;;  %1802 = vmatpush1.bf16.msra.mxu0 %v2188_v32 }
 0x15b   : > { %v1113_v45 = vrot.slane %v1109_v40, 4  ;;  %v1112_v46 = vrot.slane %v1107_v43, 4  ;;  %1803 = vmatprep.subr.bf16.mxu0 %v2186_v28 }
 0x15c   : > { %1172 = vrot.lane.b32.xlu1 %v3062_v4, %s2700_s9  ;;  %1170 = vrot.lane.b32.xlu0 %v3065_v5, %s2700_s9 }
 0x15d   : > { %v1119_v47 = vsel %vm520_vm3, %v1109_v40, %v1113_v45  ;;  %v1117_v48 = vsel %vm378_vm0, %v1112_v46, %v1113_v45 }
 0x15e   : > { %1127 = vst [vmem:[#allocation3 + $0x23c] sm:$0xf] %v1119_v47  ;;  %v1118_v49 = vsel %vm520_vm3, %v1107_v43, %v1117_v48  ;;  %v843_v50 = vpop.permute.xlu1 %842  ;;  %v841_v8 = vpop.permute.xlu0 %840  ;;  %1804 = vmatpush1.bf16.msra.mxu0 %v2185_v44  ;;  %v655_v43 = vld [vmem:[%s2890_s21 + $0x8] sm:$0xf]  ;;  %v657_v44 = vld [vmem:[%s2890_s21 + $0x18] sm:$0xf] }
 0x15f   : > { %v849_v0 = vrot.slane %v843_v50, 4  ;;  %v848_v1 = vrot.slane %v841_v8, 4  ;;  %v2255_v9 = vcombine.high %v1115_v39, %v1118_v49  ;;  %v2254_v51 = vcombine.low %v1115_v39, %v1118_v49  ;;  %659 = vst [vmem:[#allocation3 + $0xe0] sm:$0xf] %v655_v43  ;;  %661 = vst [vmem:[#allocation3 + $0xec] sm:$0xf] %v657_v44 }
 0x160   : > { %1176 = vrot.lane.b32.xlu1 %v3072_v6, %s2700_s9  ;;  %1174 = vrot.lane.b32.xlu0 %v3075_v7, %s2700_s9  ;;  %s1971_s21 = sshll.u32 %s2970_s2, 4  ;;  %s1972_s21 = int_to_ptr.vmem [resolvable:$true] %s1971_s21 }
 0x161   : > { %v854_v52 = vsel %vm555_vm2, %v843_v50, %v849_v0  ;;  %v852_v55 = vsel %vm378_vm0, %v848_v1, %v849_v0  ;;  %1830 = vmatprep.subr.bf16.mxu1 %v2255_v9  ;;  %v351_v9 = vld [vmem:[%s2841_s22 + $0x8] sm:$0xf]  ;;  %s2584_s13 = scalar_lea.vmem %s1972_s21, 384  ;;  %p2591_p13 = scmp.lt.s32.totalorder %s1972_s21, %s2589_s7 }
 0x162   : > { %863 = vst [vmem:[#allocation3 + $0x170] sm:$0xf] %v854_v52  ;;  %v853_v60 = vsel %vm555_vm2, %v841_v8, %v852_v55  ;;  %v847_v61 = vpop.permute.xlu1 %846  ;;  %v845_v11 = vpop.permute.xlu0 %844  ;;  %1831 = vmatpush1.bf16.msra.mxu1 %v2254_v51  ;;  %v353_v51 = vld [vmem:[%s2841_s22 + $0x18] sm:$0xf]  ;;  %355 = vst [vmem:[#allocation3 + $0x8] sm:$0xf] %v351_v9  ;;  %p2585_p9 = scmp.ne.s32.totalorder %s1972_s21, %s2584_s13  ;;  %p2592_p0 = scmp.lt.s32.totalorder %s2590_s25, %s2584_s13 }
 0x163   : > { %v851_v63 = vrot.slane %v847_v61, 4  ;;  %v850_v12 = vrot.slane %v845_v11, 4  ;;  %357 = vst [vmem:[#allocation3 + $0x14] sm:$0xf] %v353_v51  ;;  %s2305_s22 = smul.u32 3, %s2680_s12  ;;  %s1955_s12 = scalar_lea.sflag [#allocation7], %s3543_s1 }
 0x164   : > { %1138 = vrot.lane.b32.xlu1 %v3062_v4, %s2701_s14  ;;  %1136 = vrot.lane.b32.xlu0 %v3065_v5, %s2701_s14  ;;  %p2586_p10 = pnand %p2585_p9, %p2777_p3  ;;  %p2593_p1 = por %p2592_p0, %p2591_p13 }
 0x165   : > { %v857_v13 = vsel %vm555_vm2, %v847_v61, %v851_v63  ;;  %v855_v14 = vsel %vm378_vm0, %v850_v12, %v851_v63  ;;  %s1967_s18 = sadd.s32 %s2306_s4, %s2305_s22 }
 0x166   : > { %865 = vst [vmem:[#allocation3 + $0x17c] sm:$0xf] %v857_v13  ;;  %v856_v15 = vsel %vm555_vm2, %v845_v11, %v855_v14  ;;  %v1071_v16 = vpop.permute.xlu1 %1070  ;;  %v1069_v17 = vpop.permute.xlu0 %1068  ;;  %s2268_s5 = sshll.u32 %s1967_s18, 7  ;;  %p2587_p11 = pneg %p2586_p10 }
 0x167   : > { %v1077_v3 = vrot.slane %v1071_v16, 4  ;;  %v1076_v18 = vrot.slane %v1069_v17, 4  ;;  %v2231_v19 = vcombine.high %v853_v60, %v856_v15  ;;  %v2230_v20 = vcombine.low %v853_v60, %v856_v15  ;;  %s3452_s19 = scalar_lea.hbm %s3542_s27, %s2268_s5 }
 0x168   : > { %1142 = vrot.lane.b32.xlu1 %v3072_v6, %s2701_s14  ;;  %1140 = vrot.lane.b32.xlu0 %v3075_v7, %s2701_s14  ;;  %p2594_p2 = pnand %p2593_p1, %p2587_p11 }
 0x169   : > { %v1082_v4 = vsel %vm485_vm4, %v1071_v16, %v1077_v3  ;;  %v1080_v5 = vsel %vm378_vm0, %v1076_v18, %v1077_v3  ;;  %1805 = vmatprep.subr.bf16.mxu0 %v2231_v19 }
 0x16a   : > { %1091 = vst [vmem:[#allocation3 + $0x218] sm:$0xf] %v1082_v4  ;;  %v1081_v21 = vsel %vm485_vm4, %v1069_v17, %v1080_v5  ;;  %v1075_v22 = vpop.permute.xlu1 %1074  ;;  %v1073_v23 = vpop.permute.xlu0 %1072  ;;  %1806 = vmatpush2.bf16.msra.mxu0 %v2230_v20 }
 0x16b   : > { %v1079_v2 = vrot.slane %v1075_v22, 4  ;;  %v1078_v24 = vrot.slane %v1073_v23, 4 }
 0x16d   : > { %v1085_v25 = vsel %vm485_vm4, %v1075_v22, %v1079_v2  ;;  %v1083_v6 = vsel %vm378_vm0, %v1078_v24, %v1079_v2 }
 0x16e   : > { %1093 = vst [vmem:[#allocation3 + $0x224] sm:$0xf] %v1085_v25  ;;  %v1084_v7 = vsel %vm485_vm4, %v1073_v23, %v1083_v6  ;;  %v809_v26 = vpop.permute.xlu1 %808  ;;  %v807_v27 = vpop.permute.xlu0 %806 }
 0x16f   : > { %v815_v28 = vrot.slane %v809_v26, 4  ;;  %v814_v29 = vrot.slane %v807_v27, 4  ;;  %v2252_v30 = vcombine.high %v1081_v21, %v1084_v7  ;;  %v2251_v31 = vcombine.low %v1081_v21, %v1084_v7 }
 0x171   : > { %v820_v32 = vsel %vm520_vm3, %v809_v26, %v815_v28  ;;  %v818_v33 = vsel %vm378_vm0, %v814_v29, %v815_v28  ;;  %1832 = vmatprep.subr.bf16.mxu1 %v2252_v30 }
 0x172   : > { %829 = vst [vmem:[#allocation3 + $0x158] sm:$0xf] %v820_v32  ;;  %v819_v34 = vsel %vm520_vm3, %v807_v27, %v818_v33  ;;  %v813_v35 = vpop.permute.xlu1 %812  ;;  %v811_v36 = vpop.permute.xlu0 %810  ;;  %1833 = vmatpush1.bf16.msra.mxu1 %v2251_v31 }
 0x173   : > { %v817_v39 = vrot.slane %v813_v35, 4  ;;  %v816_v40 = vrot.slane %v811_v36, 4 }
 0x175   : > { %v823_v45 = vsel %vm520_vm3, %v813_v35, %v817_v39  ;;  %v821_v46 = vsel %vm378_vm0, %v816_v40, %v817_v39 }
 0x176   : > { %831 = vst [vmem:[#allocation3 + $0x164] sm:$0xf] %v823_v45  ;;  %v822_v47 = vsel %vm520_vm3, %v811_v36, %v821_v46  ;;  %v1037_v48 = vpop.permute.xlu1 %1036  ;;  %v1035_v49 = vpop.permute.xlu0 %1034 }
 0x177   : > { %v1043_v50 = vrot.slane %v1037_v48, 4  ;;  %v1042_v8 = vrot.slane %v1035_v49, 4  ;;  %v2228_v0 = vcombine.high %v819_v34, %v822_v47  ;;  %v2227_v1 = vcombine.low %v819_v34, %v822_v47 }
 0x179   : > { %v1048_v52 = vsel %vm450_vm5, %v1037_v48, %v1043_v50  ;;  %v1046_v55 = vsel %vm378_vm0, %v1042_v8, %v1043_v50  ;;  %1807 = vmatprep.subr.bf16.mxu0 %v2228_v0 }
 0x17a   : > { %1057 = vst [vmem:[#allocation3 + $0x200] sm:$0xf] %v1048_v52  ;;  %v1047_v60 = vsel %vm450_vm5, %v1035_v49, %v1046_v55  ;;  %v1041_v61 = vpop.permute.xlu1 %1040  ;;  %v1039_v11 = vpop.permute.xlu0 %1038  ;;  %1808 = vmatpush2.bf16.msra.mxu0 %v2227_v1 }
 0x17b   : > { %v1045_v63 = vrot.slane %v1041_v61, 4  ;;  %v1044_v12 = vrot.slane %v1039_v11, 4 }
 0x17d   : > { %v1051_v13 = vsel %vm450_vm5, %v1041_v61, %v1045_v63  ;;  %v1049_v14 = vsel %vm378_vm0, %v1044_v12, %v1045_v63 }
 0x17e   : > { %1059 = vst [vmem:[#allocation3 + $0x20c] sm:$0xf] %v1051_v13  ;;  %v1050_v15 = vsel %vm450_vm5, %v1039_v11, %v1049_v14  ;;  %v775_v16 = vpop.permute.xlu1 %774  ;;  %v773_v17 = vpop.permute.xlu0 %772 }
 0x17f   : > { %v781_v3 = vrot.slane %v775_v16, 4  ;;  %v780_v18 = vrot.slane %v773_v17, 4  ;;  %v2249_v19 = vcombine.high %v1047_v60, %v1050_v15  ;;  %v2248_v20 = vcombine.low %v1047_v60, %v1050_v15 }
 0x181   : > { %v786_v4 = vsel %vm485_vm4, %v775_v16, %v781_v3  ;;  %v784_v5 = vsel %vm378_vm0, %v780_v18, %v781_v3  ;;  %1834 = vmatprep.subr.bf16.mxu1 %v2249_v19 }
 0x182   : > { %795 = vst [vmem:[#allocation3 + $0x140] sm:$0xf] %v786_v4  ;;  %v785_v21 = vsel %vm485_vm4, %v773_v17, %v784_v5  ;;  %v779_v22 = vpop.permute.xlu1 %778  ;;  %v777_v23 = vpop.permute.xlu0 %776  ;;  %1835 = vmatpush1.bf16.msra.mxu1 %v2248_v20 }
 0x183   : > { %v783_v2 = vrot.slane %v779_v22, 4  ;;  %v782_v24 = vrot.slane %v777_v23, 4 }
 0x185   : > { %v789_v25 = vsel %vm485_vm4, %v779_v22, %v783_v2  ;;  %v787_v6 = vsel %vm378_vm0, %v782_v24, %v783_v2 }
 0x186   : > { %797 = vst [vmem:[#allocation3 + $0x14c] sm:$0xf] %v789_v25  ;;  %v788_v7 = vsel %vm485_vm4, %v777_v23, %v787_v6  ;;  %v1003_v26 = vpop.permute.xlu1 %1002  ;;  %v1001_v27 = vpop.permute.xlu0 %1000 }
 0x187   : > { %v1009_v28 = vrot.slane %v1003_v26, 4  ;;  %v1008_v29 = vrot.slane %v1001_v27, 4  ;;  %v2225_v30 = vcombine.high %v785_v21, %v788_v7  ;;  %v2224_v31 = vcombine.low %v785_v21, %v788_v7 }
 0x189   : > { %v1014_v32 = vsel %vm415_vm6, %v1003_v26, %v1009_v28  ;;  %v1012_v33 = vsel %vm378_vm0, %v1008_v29, %v1009_v28  ;;  %1809 = vmatprep.subr.bf16.mxu0 %v2225_v30 }
 0x18a   : > { %1023 = vst [vmem:[#allocation3 + $0x1e8] sm:$0xf] %v1014_v32  ;;  %v1013_v34 = vsel %vm415_vm6, %v1001_v27, %v1012_v33  ;;  %v1007_v35 = vpop.permute.xlu1 %1006  ;;  %v1005_v36 = vpop.permute.xlu0 %1004  ;;  %1810 = vmatpush2.bf16.msra.mxu0 %v2224_v31 }
 0x18b   : > { %v1011_v39 = vrot.slane %v1007_v35, 4  ;;  %v1010_v40 = vrot.slane %v1005_v36, 4 }
 0x18d   : > { %v1017_v43 = vsel %vm415_vm6, %v1007_v35, %v1011_v39  ;;  %v1015_v44 = vsel %vm378_vm0, %v1010_v40, %v1011_v39 }
 0x18e   : > { %1025 = vst [vmem:[#allocation3 + $0x1f4] sm:$0xf] %v1017_v43  ;;  %v1016_v45 = vsel %vm415_vm6, %v1005_v36, %v1015_v44  ;;  %v741_v46 = vpop.permute.xlu1 %740  ;;  %v739_v47 = vpop.permute.xlu0 %738 }
 0x18f   : > { %v747_v48 = vrot.slane %v741_v46, 4  ;;  %v746_v49 = vrot.slane %v739_v47, 4  ;;  %v2246_v50 = vcombine.high %v1013_v34, %v1016_v45  ;;  %v2245_v8 = vcombine.low %v1013_v34, %v1016_v45 }
 0x191   : > { %v752_v0 = vsel %vm450_vm5, %v741_v46, %v747_v48  ;;  %v750_v1 = vsel %vm378_vm0, %v746_v49, %v747_v48  ;;  %1836 = vmatprep.subr.bf16.mxu1 %v2246_v50 }
 0x192   : > { %761 = vst [vmem:[#allocation3 + $0x128] sm:$0xf] %v752_v0  ;;  %v751_v9 = vsel %vm450_vm5, %v739_v47, %v750_v1  ;;  %v745_v51 = vpop.permute.xlu1 %744  ;;  %v743_v52 = vpop.permute.xlu0 %742  ;;  %1837 = vmatpush1.bf16.msra.mxu1 %v2245_v8 }
 0x193   : > { %v749_v55 = vrot.slane %v745_v51, 4  ;;  %v748_v60 = vrot.slane %v743_v52, 4 }
 0x195   : > { %v755_v61 = vsel %vm450_vm5, %v745_v51, %v749_v55  ;;  %v753_v11 = vsel %vm378_vm0, %v748_v60, %v749_v55 }
 0x196   : > { %763 = vst [vmem:[#allocation3 + $0x134] sm:$0xf] %v755_v61  ;;  %v754_v63 = vsel %vm450_vm5, %v743_v52, %v753_v11  ;;  %v969_v12 = vpop.permute.xlu1 %968  ;;  %v967_v13 = vpop.permute.xlu0 %966 }
 0x197   : > { %v975_v14 = vrot.slane %v969_v12, 4  ;;  %v974_v15 = vrot.slane %v967_v13, 4  ;;  %v2222_v16 = vcombine.high %v751_v9, %v754_v63  ;;  %v2221_v17 = vcombine.low %v751_v9, %v754_v63 }
 0x199   : > { %v980_v3 = vsel %vm380_vm7, %v969_v12, %v975_v14  ;;  %v978_v18 = vsel %vm378_vm0, %v974_v15, %v975_v14  ;;  %1811 = vmatprep.subr.bf16.mxu0 %v2222_v16 }
 0x19a   : > { %989 = vst [vmem:[#allocation3 + $0x1d0] sm:$0xf] %v980_v3  ;;  %v979_v19 = vsel %vm380_vm7, %v967_v13, %v978_v18  ;;  %v973_v20 = vpop.permute.xlu1 %972  ;;  %v971_v4 = vpop.permute.xlu0 %970  ;;  %1812 = vmatpush2.bf16.msra.mxu0 %v2221_v17 }
 0x19b   : > { %v977_v5 = vrot.slane %v973_v20, 4  ;;  %v976_v21 = vrot.slane %v971_v4, 4 }
 0x19d   : > { %v983_v22 = vsel %vm380_vm7, %v973_v20, %v977_v5  ;;  %v981_v23 = vsel %vm378_vm0, %v976_v21, %v977_v5 }
 0x19e   : > { %991 = vst [vmem:[#allocation3 + $0x1dc] sm:$0xf] %v983_v22  ;;  %v982_v2 = vsel %vm380_vm7, %v971_v4, %v981_v23  ;;  %v707_v24 = vpop.permute.xlu1 %706  ;;  %v705_v25 = vpop.permute.xlu0 %704 }
 0x19f   : > { %v713_v6 = vrot.slane %v707_v24, 4  ;;  %v712_v7 = vrot.slane %v705_v25, 4  ;;  %v2243_v26 = vcombine.high %v979_v19, %v982_v2  ;;  %v2242_v27 = vcombine.low %v979_v19, %v982_v2 }
 0x1a1   : > { %v718_v28 = vsel %vm415_vm6, %v707_v24, %v713_v6  ;;  %v716_v29 = vsel %vm378_vm0, %v712_v7, %v713_v6  ;;  %1838 = vmatprep.subr.bf16.mxu1 %v2243_v26 }
 0x1a2   : > { %727 = vst [vmem:[#allocation3 + $0x110] sm:$0xf] %v718_v28  ;;  %v717_v30 = vsel %vm415_vm6, %v705_v25, %v716_v29  ;;  %v711_v31 = vpop.permute.xlu1 %710  ;;  %v709_v32 = vpop.permute.xlu0 %708  ;;  %1839 = vmatpush1.bf16.msra.mxu1 %v2242_v27 }
 0x1a3   : > { %v715_v33 = vrot.slane %v711_v31, 4  ;;  %v714_v34 = vrot.slane %v709_v32, 4  ;;  %1840 = vmatprep.subr.bf16.mxu1 %v2240_v57 }
 0x1a5   : > { %v721_v35 = vsel %vm415_vm6, %v711_v31, %v715_v33  ;;  %v719_v36 = vsel %vm378_vm0, %v714_v34, %v715_v33 }
 0x1a6   : > { %729 = vst [vmem:[#allocation3 + $0x11c] sm:$0xf] %v721_v35  ;;  %v720_v39 = vsel %vm415_vm6, %v709_v32, %v719_v36  ;;  %v673_v40 = vpop.permute.xlu1 %672  ;;  %v671_v43 = vpop.permute.xlu0 %670  ;;  %1841 = vmatpush1.bf16.msra.mxu1 %v2239_v58 }
 0x1a7   : > { %v679_v44 = vrot.slane %v673_v40, 4  ;;  %v678_v45 = vrot.slane %v671_v43, 4  ;;  %v2219_v46 = vcombine.high %v717_v30, %v720_v39  ;;  %v2218_v47 = vcombine.low %v717_v30, %v720_v39 }
 0x1a9   : > { %v684_v48 = vsel %vm380_vm7, %v673_v40, %v679_v44  ;;  %v682_v57 = vsel %vm378_vm0, %v678_v45, %v679_v44  ;;  %1813 = vmatprep.subr.bf16.mxu0 %v2219_v46 }
 0x1aa   : > { %693 = vst [vmem:[#allocation3 + $0xf8] sm:$0xf] %v684_v48  ;;  %v683_v49 = vsel %vm380_vm7, %v671_v43, %v682_v57  ;;  %v677_v50 = vpop.permute.xlu1 %676  ;;  %v675_v8 = vpop.permute.xlu0 %674  ;;  %1814 = vmatpush2.bf16.msra.mxu0 %v2218_v47 }
 0x1ab   : > { %v681_v0 = vrot.slane %v677_v50, 4  ;;  %v680_v1 = vrot.slane %v675_v8, 4 }
 0x1ad   : > { %v687_v53 = vsel %vm380_vm7, %v677_v50, %v681_v0  ;;  %v685_v54 = vsel %vm378_vm0, %v680_v1, %v681_v0  ;;  %v3408_v1 = vcombine.low %v3242_v59, %v3242_v59 }
 0x1ae   : > { %695 = vst [vmem:[#allocation3 + $0x104] sm:$0xf] %v687_v53  ;;  %v686_v58 = vsel %vm380_vm7, %v675_v8, %v685_v54  ;;  %v911_v9 = vpop.permute.xlu1 %910  ;;  %v909_v51 = vpop.permute.xlu0 %908 }
 0x1af   : > { %v917_v52 = vrot.slane %v911_v9, 4  ;;  %v916_v55 = vrot.slane %v909_v51, 4  ;;  %v2216_v60 = vcombine.high %v683_v49, %v686_v58  ;;  %v2215_v61 = vcombine.low %v683_v49, %v686_v58 }
 0x1b1   : > { %v922_v11 = vsel %vm625_vm9, %v911_v9, %v917_v52  ;;  %v920_v63 = vsel %vm378_vm0, %v916_v55, %v917_v52  ;;  %1815 = vmatprep.subr.bf16.mxu0 %v2216_v60  ;;  %v2708_v52 = vmov 0   ;;  %v2422_v55 = vld [vmem:[#allocation3 + $0x230] ss:$12 sps:$4 sm:$0xff]  }
 0x1b2   : > { %931 = vst [vmem:[#allocation3 + $0x1a0] sm:$0xf] %v922_v11  ;;  %v921_v12 = vsel %vm625_vm9, %v909_v51, %v920_v63  ;;  %v915_v13 = vpop.permute.xlu1 %914  ;;  %v913_v14 = vpop.permute.xlu0 %912  ;;  %1816 = vmatpush2.bf16.msra.mxu0 %v2215_v61 }
 0x1b3   : > { %v919_v15 = vrot.slane %v915_v13, 4  ;;  %v918_v16 = vrot.slane %v913_v14, 4  ;;  %1817 = vmatprep.subr.bf16.mxu0 %v2213_v41 }
 0x1b5   : > { %v925_v17 = vsel %vm625_vm9, %v915_v13, %v919_v15  ;;  %v923_v3 = vsel %vm378_vm0, %v918_v16, %v919_v15  ;;  %v2423_v16 = vld [vmem:[#allocation3 + $0x218] ss:$12 sps:$4 sm:$0xff]  }
 0x1b6   : > { %933 = vst [vmem:[#allocation3 + $0x1ac] sm:$0xf] %v925_v17  ;;  %v924_v18 = vsel %vm625_vm9, %v913_v14, %v923_v3  ;;  %v877_v19 = vpop.permute.xlu1 %876  ;;  %v875_v20 = vpop.permute.xlu0 %874  ;;  %1818 = vmatpush2.bf16.msra.mxu0 %v2212_v42 }
 0x1b7   : > { %v883_v4 = vrot.slane %v877_v19, 4  ;;  %v882_v5 = vrot.slane %v875_v20, 4  ;;  %v2237_v21 = vcombine.high %v921_v12, %v924_v18  ;;  %v2236_v22 = vcombine.low %v921_v12, %v924_v18 }
 0x1b9   : > { %v888_v23 = vsel %vm590_vm1, %v877_v19, %v883_v4  ;;  %v886_v41 = vsel %vm378_vm0, %v882_v5, %v883_v4  ;;  %1842 = vmatprep.subr.bf16.mxu1 %v2237_v21  ;;  %v2424_v5 = vld [vmem:[#allocation3 + $0x200] ss:$12 sps:$4 sm:$0xff]  }
 0x1ba   : > { %897 = vst [vmem:[#allocation3 + $0x188] sm:$0xf] %v888_v23  ;;  %v887_v2 = vsel %vm590_vm1, %v875_v20, %v886_v41  ;;  %v881_v24 = vpop.permute.xlu1 %880  ;;  %v879_v25 = vpop.permute.xlu0 %878  ;;  %1843 = vmatpush1.bf16.msra.mxu1 %v2236_v22 }
 0x1bb   : > { %v885_v6 = vrot.slane %v881_v24, 4  ;;  %v884_v7 = vrot.slane %v879_v25, 4 }
 0x1bd   : > { %v891_v37 = vsel %vm590_vm1, %v881_v24, %v885_v6  ;;  %v889_v38 = vsel %vm378_vm0, %v884_v7, %v885_v6 }
 0x1be   : > { %899 = vst [vmem:[#allocation3 + $0x194] sm:$0xf] %v891_v37  ;;  %v890_v42 = vsel %vm590_vm1, %v879_v25, %v889_v38  ;;  %v615_v26 = vpop.permute.xlu1 %614  ;;  %v613_v27 = vpop.permute.xlu0 %612  ;;  %v2425_v37 = vld [vmem:[#allocation3 + $0x1e8] ss:$12 sps:$4 sm:$0xff]  }
 0x1bf   : > { %v621_v28 = vrot.slane %v615_v26, 4  ;;  %v620_v29 = vrot.slane %v613_v27, 4  ;;  %v2234_v30 = vcombine.high %v887_v2, %v890_v42  ;;  %v2233_v31 = vcombine.low %v887_v2, %v890_v42 }
 0x1c1   : > { %v627_v32 = vsel %vm625_vm9, %v615_v26, %v621_v28  ;;  %v624_v33 = vsel %vm378_vm0, %v620_v29, %v621_v28  ;;  %1844 = vmatprep.subr.bf16.mxu1 %v2234_v30 }
 0x1c2   : > { %636 = vst [vmem:[#allocation3 + $0xc8] sm:$0xf] %v627_v32  ;;  %v626_v34 = vsel %vm625_vm9, %v613_v27, %v624_v33  ;;  %v619_v35 = vpop.permute.xlu1 %618  ;;  %v617_v36 = vpop.permute.xlu0 %616  ;;  %1845 = vmatpush1.bf16.msra.mxu1 %v2233_v31  ;;  %v2426_v31 = vld [vmem:[#allocation3 + $0x1d0] ss:$12 sps:$4 sm:$0xff]  }
 0x1c3   : > { %v623_v39 = vrot.slane %v619_v35, 4  ;;  %v622_v40 = vrot.slane %v617_v36, 4 }
 0x1c5   : > { %v630_v43 = vsel %vm625_vm9, %v619_v35, %v623_v39  ;;  %v628_v44 = vsel %vm378_vm0, %v622_v40, %v623_v39  ;;  %v2427_v35 = vld [vmem:[#allocation3 + $0x1b8] ss:$12 sps:$4 sm:$0xff]   ;;  %v2428_v40 = vld [vmem:[#allocation3 + $0x170] ss:$12 sps:$4 sm:$0xff]  }
 0x1c6   : > { %638 = vst [vmem:[#allocation3 + $0xd4] sm:$0xf] %v630_v43  ;;  %v629_v45 = vsel %vm625_vm9, %v617_v36, %v628_v44  ;;  %v1207_v46 = vpop.permute.xlu1 %1206  ;;  %v1205_v47 = vpop.permute.xlu0 %1204  ;;  %v2183_v43 = vcombine.low %v3296_v56, %v3296_v56  ;;  %v2431_v44 = vld [vmem:[#allocation3 + $0xb0] ss:$12 sps:$4 sm:$0xff]   ;;  %v2437_v56 = vld [vmem:[#allocation3 + $0x80] ss:$12 sps:$4 sm:$0xff]  }
 0x1c7   : > { %v1213_v48 = vrot.slane %v1207_v46, 4  ;;  %v1212_v57 = vrot.slane %v1205_v47, 4  ;;  %v2210_v49 = vcombine.high %v626_v34, %v629_v45  ;;  %v2209_v50 = vcombine.low %v626_v34, %v629_v45  ;;  %v2432_v45 = vld [vmem:[#allocation3 + $0x1a0] ss:$12 sps:$4 sm:$0xff]  }
 0x1c9   : > { %v1218_v8 = vsel %vm625_vm9, %v1207_v46, %v1213_v48  ;;  %v1216_v0 = vsel %vm378_vm0, %v1212_v57, %v1213_v48  ;;  %1819 = vmatprep.subr.bf16.mxu0 %v2210_v49  ;;  %v2433_v46 = vld [vmem:[#allocation3 + $0x158] ss:$12 sps:$4 sm:$0xff]   ;;  %v2435_v48 = vld [vmem:[#allocation3 + $0x188] ss:$12 sps:$4 sm:$0xff]   ;;  %v2436_v57 = vld [vmem:[#allocation3 + $0x140] ss:$12 sps:$4 sm:$0xff]  }
 0x1ca   : > { %1227 = vst [vmem:[#allocation3 + $0x278] sm:$0xf] %v1218_v8  ;;  %v1217_v53 = vsel %vm625_vm9, %v1205_v47, %v1216_v0  ;;  %v1211_v54 = vpop.permute.xlu1 %1210  ;;  %v1209_v58 = vpop.permute.xlu0 %1208  ;;  %1820 = vmatpush2.bf16.msra.mxu0 %v2209_v50  ;;  %v2434_v47 = vld [vmem:[#allocation3 + $0x98] ss:$12 sps:$4 sm:$0xff]   ;;  %v2439_v50 = vld [vmem:[#allocation3 + $0x128] ss:$12 sps:$4 sm:$0xff]  }
 0x1cb   : > { %v1215_v9 = vrot.slane %v1211_v54, 4  ;;  %v1214_v51 = vrot.slane %v1209_v58, 4  ;;  %1911 = vmatprep.subr.bf16.mxu0 %v2708_v52  ;;  %v2440_v8 = vld [vmem:[#allocation3 + $0x68] ss:$12 sps:$4 sm:$0xff]  }
 0x1cd   : > { %v1221_v60 = vsel %vm625_vm9, %v1211_v54, %v1215_v9  ;;  %v1219_v61 = vsel %vm378_vm0, %v1214_v51, %v1215_v9  ;;  %1822 = vmatmul.mubr.bf16.vlgmr.msra.gmra.mxu0 %v3408_v1  ;;  %v2447_v9 = vld [vmem:[#allocation3 + $0xe0] ss:$12 sps:$4 sm:$0xff]   ;;  %v2446_v51 = vld [vmem:[#allocation3 + $0x38] ss:$12 sps:$4 sm:$0xff]  }
 0x1ce   : > { %1229 = vst [vmem:[#allocation3 + $0x284] sm:$0xf] %v1221_v60  ;;  %v1220_v59 = vsel %vm625_vm9, %v1209_v58, %v1219_v61  ;;  %v1173_v11 = vpop.permute.xlu1 %1172  ;;  %v1171_v63 = vpop.permute.xlu0 %1170  ;;  %1912 = vmatpush1.bf16.msra.mxu0 %v2422_v55  ;;  %2267 = vmatprep.mubr.msk.bf16.mxu0 %vm1785_vm8, %v3301_v62  ;;  %v2445_v58 = vld [vmem:[#allocation3 + $0xf8] ss:$12 sps:$4 sm:$0xff]   ;;  %v2448_v55 = vld [vmem:[#allocation3 + $0x20] ss:$12 sps:$4 sm:$0xff]  }
 0x1cf   : > { %v1179_v12 = vrot.slane %v1173_v11, 4  ;;  %v1178_v13 = vrot.slane %v1171_v63, 4  ;;  %v2264_v14 = vcombine.high %v1217_v53, %v1220_v59  ;;  %1913 = vmatprep.subr.bf16.mxu0 %v2708_v52  ;;  %v2263_v15 = vcombine.low %v1217_v53, %v1220_v59  ;;  %v2442_v53 = vld [vmem:[#allocation3 + $0x110] ss:$12 sps:$4 sm:$0xff]   ;;  %v2449_v60 = vld [vmem:[#allocation3 + $0xc8] ss:$12 sps:$4 sm:$0xff]  }
 0x1d0   : > { %v2450_v61 = vld [vmem:[#allocation3 + $0x8] ss:$12 sps:$4 sm:$0xff]  }
 0x1d1   : > { %v1184_v17 = vsel %vm590_vm1, %v1173_v11, %v1179_v12  ;;  %v1182_v3 = vsel %vm378_vm0, %v1178_v13, %v1179_v12  ;;  %1856 = vmatprep.subr.bf16.mxu1 %v2264_v14 }
 0x1d2   : > { %1193 = vst [vmem:[#allocation3 + $0x260] sm:$0xf] %v1184_v17  ;;  %v1183_v18 = vsel %vm590_vm1, %v1171_v63, %v1182_v3  ;;  %v1177_v19 = vpop.permute.xlu1 %1176  ;;  %v1175_v20 = vpop.permute.xlu0 %1174  ;;  %1857 = vmatpush2.bf16.msra.mxu1 %v2263_v15  ;;  %1914 = vmatpush1.bf16.msra.mxu0 %v2423_v16 }
 0x1d3   : > { %v1181_v62 = vrot.slane %v1177_v19, 4  ;;  %v1180_v4 = vrot.slane %v1175_v20, 4  ;;  %1915 = vmatprep.subr.bf16.mxu0 %v2708_v52 }
 0x1d5   : > { %v1187_v21 = vsel %vm590_vm1, %v1177_v19, %v1181_v62  ;;  %v1185_v22 = vsel %vm378_vm0, %v1180_v4, %v1181_v62  ;;  %v2438_v49 = vld [vmem:[#allocation3 + $0x278] ss:$12 sps:$4 sm:$0xff]  }
 0x1d6   : > { %1195 = vst [vmem:[#allocation3 + $0x26c] sm:$0xf] %v1187_v21  ;;  %v1186_v23 = vsel %vm590_vm1, %v1175_v20, %v1185_v22  ;;  %v1139_v41 = vpop.permute.xlu1 %1138  ;;  %v1137_v2 = vpop.permute.xlu0 %1136  ;;  %1916 = vmatpush1.bf16.msra.mxu0 %v2424_v5 }
 0x1d7   : > { %v1145_v24 = vrot.slane %v1139_v41, 4  ;;  %v1144_v25 = vrot.slane %v1137_v2, 4  ;;  %v2261_v6 = vcombine.high %v1183_v18, %v1186_v23  ;;  %1917 = vmatprep.subr.bf16.mxu0 %v2708_v52  ;;  %v2260_v7 = vcombine.low %v1183_v18, %v1186_v23 }
 0x1d9   : > { %v1150_v38 = vsel %vm555_vm2, %v1139_v41, %v1145_v24  ;;  %v1148_v42 = vsel %vm378_vm0, %v1144_v25, %v1145_v24  ;;  %1858 = vmatprep.subr.bf16.mxu1 %v2261_v6 }
 0x1da   : > { %1159 = vst [vmem:[#allocation3 + $0x248] sm:$0xf] %v1150_v38  ;;  %v1149_v26 = vsel %vm555_vm2, %v1137_v2, %v1148_v42  ;;  %v1143_v27 = vpop.permute.xlu1 %1142  ;;  %v1141_v28 = vpop.permute.xlu0 %1140  ;;  %1859 = vmatpush2.bf16.msra.mxu1 %v2260_v7  ;;  %1918 = vmatpush1.bf16.msra.mxu0 %v2425_v37 }
 0x1db   : > { %v1147_v29 = vrot.slane %v1143_v27, 4  ;;  %v1146_v30 = vrot.slane %v1141_v28, 4  ;;  %1919 = vmatprep.subr.bf16.mxu0 %v2708_v52 }
 0x1dd   : > { %v1153_v32 = vsel %vm555_vm2, %v1143_v27, %v1147_v29  ;;  %v1151_v33 = vsel %vm378_vm0, %v1146_v30, %v1147_v29  ;;  %v2441_v0 = vld [vmem:[#allocation3 + $0x260] ss:$12 sps:$4 sm:$0xff]  }
 0x1de   : > { %1161 = vst [vmem:[#allocation3 + $0x254] sm:$0xf] %v1153_v32  ;;  %v1152_v34 = vsel %vm555_vm2, %v1141_v28, %v1151_v33  ;;  %1920 = vmatpush1.bf16.msra.mxu0 %v2426_v31 }
 0x1df   : > { %v2258_v36 = vcombine.high %v1149_v26, %v1152_v34  ;;  %1921 = vmatprep.subr.bf16.mxu0 %v2708_v52  ;;  %v2257_v39 = vcombine.low %v1149_v26, %v1152_v34 }
 0x1e1   : > { %1860 = vmatprep.subr.bf16.mxu1 %v2258_v36 }
 0x1e2   : > { %1861 = vmatpush2.bf16.msra.mxu1 %v2257_v39  ;;  %1922 = vmatpush1.bf16.msra.mxu0 %v2427_v35 }
 0x1e3   : > { %2282 = vmatprep.subr.bf16.mxu1 %v2428_v40  ;;  %1923 = vmatprep.subr.bf16.mxu0 %v2708_v52 }
 0x1e5   : > { %1863 = vmatmul.mubr.bf16.vlgmr.msra.gmra.mxu1 %v2183_v43  ;;  %v2444_v54 = vld [vmem:[#allocation3 + $0x248] ss:$12 sps:$4 sm:$0xff]  }
 0x1e6   : > { %2283 = vmatpush3.bf16.msra.mxu1 %v2431_v44  ;;  %1924 = vmatpush1.bf16.msra.mxu0 %v2432_v45 }
 0x1e7   : > { %2284 = vmatprep.subr.bf16.mxu1 %v2433_v46  ;;  %1925 = vmatprep.subr.bf16.mxu0 %v2708_v52 }
 0x1e8   : > { %1903 = vmatprep.mubr.bf16.mxu1 %v3246_v10  ;;  %v2443_v10 = vld [vmem:[#allocation3 + $0x50] ss:$12 sps:$4 sm:$0xff]  }
 0x1ea   : > { %2285 = vmatpush3.bf16.msra.mxu1 %v2434_v47  ;;  %1926 = vmatpush1.bf16.msra.mxu0 %v2435_v48 }
 0x1eb   : > { %2286 = vmatprep.subr.bf16.mxu1 %v2436_v57  ;;  %1937 = vmatprep.subr.bf16.mxu0 %v2708_v52 }
 0x1ee   : > { %2287 = vmatpush3.bf16.msra.mxu1 %v2437_v56  ;;  %1938 = vmatpush2.bf16.msra.mxu0 %v2438_v49 }
 0x1ef   : > { %2288 = vmatprep.subr.bf16.mxu1 %v2439_v50  ;;  %1939 = vmatprep.subr.bf16.mxu0 %v2708_v52 }
 0x1f2   : > { %2289 = vmatpush3.bf16.msra.mxu1 %v2440_v8  ;;  %1940 = vmatpush2.bf16.msra.mxu0 %v2441_v0 }
 0x1f3   : > { %2290 = vmatprep.subr.bf16.mxu1 %v2442_v53  ;;  %1941 = vmatprep.subr.bf16.mxu0 %v2708_v52 }
 0x1f6   : > { %2291 = vmatpush3.bf16.msra.mxu1 %v2443_v10  ;;  %1942 = vmatpush2.bf16.msra.mxu0 %v2444_v54 }
 0x1f7   : > { %2292 = vmatprep.subr.bf16.mxu1 %v2445_v58 }
 0x1f9   : > { %1944 = vmatmul.mubr.bf16.vlgmr.msra.gmra.mxu0 %v2183_v43 }
 0x1fa   : > { %2293 = vmatpush3.bf16.msra.mxu1 %v2446_v51 }
 0x1fb   : > { %2294 = vmatprep.subr.bf16.mxu1 %v2447_v9 }
 0x1fe   : > { %2295 = vmatpush3.bf16.msra.mxu1 %v2448_v55 }
 0x1ff   : > { %2296 = vmatprep.subr.bf16.mxu1 %v2449_v60 }
 0x202   : > { %2297 = vmatpush3.bf16.msra.mxu1 %v2450_v61 }
 0x205   : > { %1904 = vmatmul.mubr.bf16.vlgmr.msra.gmra.mxu1 %v3408_v1 }
 0x28d   : > { %v1823_v52 = vpop.f32.mrf.mxu0 }
 0x28f   : > { %v1825_v59 = vpop.f32.mrf.mxu0 }
 0x291   : > { %v1827_v11 = vpop.f32.mrf.mxu0 }
 0x293   : > { %v1828_v63 = vpop.f32.mrf.mxu0 }
 0x2a5   : > { %v1864_v12 = vpop.f32.mrf.mxu1 }
 0x2a6   : > { %v1865_v13 = vadd.f32 %v1864_v12, %v1823_v52 }
 0x2a7   : > { %v1866_v14 = vpop.f32.mrf.mxu1 }
 0x2a8   : > { %1951 = vst [vmem:[%s2970_s2] sm:$0xff] %v1865_v13  ;;  %v1867_v15 = vadd.f32 %v1866_v14, %v1825_v59 }
 0x2a9   : > { %v1868_v16 = vpop.f32.mrf.mxu1 }
 0x2aa   : > { %1952 = vst [vmem:[%s2970_s2 + $0x8] sm:$0xff] %v1867_v15 }
 0x2ab   : > { %v1869_v17 = vpop.f32.mrf.mxu1 }
 0x2b9   : > { %v1945_v3 = vpop.f32.mrf.mxu0 }
 0x2bb   : > { %v1947_v18 = vpop.f32.mrf.mxu0 }
 0x2bd   : > { %v1948_v19 = vpop.f32.mrf.mxu0 }
 0x2bf   : > { %v1949_v1 = vpop.f32.mrf.mxu0 }
 0x2c5   : > { %v2298_v20 = vpop.f32.mrf.mxu1 }
 0x2c7   : > { %v2299_v62 = vpop.f32.mrf.mxu1 }
 0x2c8   : > { %v2300_v4 = vadd.f32 %v2299_v62, %v2298_v20 }
 0x2c9   : > { %v2301_v5 = vpop.f32.mrf.mxu1 }
 0x2ca   : > { %v1946_v21 = vadd.f32 %v2300_v4, %v1945_v3 }
 0x2cb   : > { %v2302_v22 = vpop.f32.mrf.mxu1 }
 0x2cc   : > { %1953 = vst [vmem:[%s2970_s2 + $0x10] sm:$0xff] %v1946_v21 }
 0x2cd   : > { %2597 = shalt.err (!%p2594_p2)
}
 0x2ce   : > { %s2598_s15 = scalar_lea.hbm %s3452_s19, 384  ;;  %s2602_s29 = scalar_lea.hbm %s3542_s27, 6144 }
 0x2cf   : > { %p2599_p12 = scmp.ne.s32.totalorder %s3452_s19, %s2598_s15  ;;  %p2603_p6 = scmp.lt.s32.totalorder %s3452_s19, %s3542_s27 }
 0x2d0   : > { %p2604_p7 = scmp.lt.s32.totalorder %s2602_s29, %s2598_s15 }
 0x2d1   : > { %p2600_p5 = pnand %p2599_p12, %p2777_p3 }
 0x2d2   : > { %p2605_p4 = por %p2604_p7, %p2603_p6 }
 0x2d3   : > { %p2601_p8 = pneg %p2600_p5 }
 0x2d5   : > { %p2606_p9 = pnand %p2605_p4, %p2601_p8 }
 0x2d7   : > { %2609 = shalt.err (!%p2606_p9)
}
 0x2d8   : > { %2323 = dma.vmem_to_hbm [thread:$0]  (%p2777_p3), %s1972_s21, 384, %s3452_s19, %s1955_s12  }
 0x2d9 PF: > { %s3544_s14 = sld [smem:[#allocation29_spill]] }
 0x2da   : > { %s3545_s16 = sld [smem:[#allocation25_spill]] }
 0x2db   : > { %s3546_s20 = sld [smem:[#allocation32_spill]] }
 0x2df   : > { %p2339_p10 = scmp.ge.s32.totalorder %s3544_s14, 2 }
 0x2e0   : > { %s1983_s24 = sand.u32 1, %s3545_s16  }
 0x2e1   : > { %p3547_p11 = scmp.ne.s32.totalorder %s3546_s20, 0  ;;  %s1984_s8 = scalar_lea.sflag [#allocation7], %s1983_s24 }
 0x2e3   : > { %p2330_p13 = pnand %p2339_p10, %p3547_p11 }
 0x2e5   : > { %p2331_p0 = pneg %p2330_p13 }
 0x2e7   : > { %2663 = dma.done.wait (%p2331_p0), %s1984_s8, 384  }
 0x2e8   : > { %2665 = vsyncadd (%p2331_p0), %s1984_s8, 4294966912  ;;  %s16_s16 = sadd.s32 1, %s3544_s14   ;;  %s3548_s28 = sld [smem:[#allocation26_spill]] }
 0x2e9   : > { %p13_p1 = scmp.ge.s32.totalorder %s16_s16, 18   ;;  %s3549_s11 = sld [smem:[#allocation33_spill]] }
 0x2ea   : > { %s3550_s12 = sld [smem:[#allocation27_spill]]  ;;  %s3554_s9 = smov %s2672_s10 }
 0x2eb   : > { %s3551_s13 = sld [smem:[#allocation28_spill]]  ;;  %15 = sbr.rel (!%p13_p1) target bundleno = 9 (0x9), region = 115 }
 0x2ec   : > { %s3552_s14 = sld [smem:[#allocation30_spill]] }
 0x2ed   : > { %s3553_s15 = sld [smem:[#allocation31_spill]] }
 0x2ee   : > { %s3555_s10 = smov %s3548_s28 }
 0x2f0   :  { %1989 = vsyncpa [#allocation6], 1 }
 0x2f1   :  { %1991 = vsyncpa [#allocation6 + $0x1], 1 }
 0x2f2   :  { %1992 = vsyncpa [#allocation7], 1 }
 0x2f3   :  { %1994 = vsyncpa [#allocation7 + $0x1], 1 }
 0x2f4   :  { %1995 = vsyncmov [#allocation4] }
 0x2f7   :  { %s1996_s23 = vpop.sfrf %1995 }
 0x2f8   :  { %p2271_p3 = scmp.ne.s32.totalorder %s1996_s23, 0 }
 0x2fa   :  { %2000 = shalt.err (%p2271_p3)  }
 0x2fb   :  { %2002 = vsyncmov [#allocation4 + $0x1] }
 0x2fe   :  { %s2003_s6 = vpop.sfrf %2002 }
 0x2ff   :  { %p2272_p2 = scmp.ne.s32.totalorder %s2003_s6, 0 }
 0x301   :  { %2007 = shalt.err (%p2272_p2)  }
 0x302   :  { %2009 = vsyncmov [#allocation4 + $0x2] }
 0x305   :  { %s2010_s22 = vpop.sfrf %2009 }
 0x306   :  { %p2273_p12 = scmp.ne.s32.totalorder %s2010_s22, 0 }
 0x308   :  { %2014 = shalt.err (%p2273_p12)  }
 0x309   :  { %2016 = vsyncmov [#allocation4 + $0x3] }
 0x30c   :  { %s2017_s4 = vpop.sfrf %2016 }
 0x30d   :  { %p2274_p5 = scmp.ne.s32.totalorder %s2017_s4, 0 }
 0x30f   :  { %2021 = shalt.err (%p2274_p5)  }

</bundles_post_ra>
